<compile_context>
chip_gen: v7x
topology: tpu7x:2x2x1
jax: 0.10.0
libtpu: 0.0.40
codegen_flags: <defaults>
</compile_context>

<pallas_src>
import functools

import jax
import jax.numpy as jnp
import numpy as np
from jax.experimental import pallas as pl
from jax.experimental.pallas import tpu as pltpu

NEG_BIG = -9000000000000000.0  # same masking constant as the PyTorch module


# --------------------------------------------------------------------------
# In-kernel helpers
# --------------------------------------------------------------------------
def _leaky_relu(x, alpha):
    return jnp.where(x >= 0, x, alpha * x)


def _elu(x):
    # ELU(alpha=1).  Clamp the exp argument so the discarded branch never
    # produces +inf (hygiene only; selected values are unchanged).
    return jnp.where(x > 0, x, jnp.exp(jnp.minimum(x, 0.0)) - 1.0)


def _diag_softmax_attn(s1, s2, adjpos, adjpos_d, eye, alpha):
    """Diagonal of the per-instance masked row-softmax.

    s1, s2   : (TB, N, 1) attention projections, one graph instance per row
               group of N.
    adjpos   : (N, N)  1.0 where adj > 0 else 0.0 (shared by all instances).
    adjpos_d : (N, 1)  its diagonal.
    eye      : (N, N)  identity; sum_k s2[g,k]*eye[k,j] = s2[g,j] gives the
               per-instance "transpose" of s2 without any XLU transpose or
               lane-crossing reshape.
    Returns attention diagonal, shape (TB, N, 1).
    """
    s2_t = jnp.sum(s2 * eye, axis=1, keepdims=True)                   # (TB,1,N)
    # Masking via where (not an additive bias) matches torch.where + softmax
    # exactly, including rows with zero valid neighbors.
    e = jnp.where(adjpos > 0.0, _leaky_relu(s1 + s2_t, alpha), NEG_BIG)
    m = jnp.max(e, axis=2, keepdims=True)                             # (TB,N,1)
    denom = jnp.sum(jnp.exp(e - m), axis=2, keepdims=True)            # (TB,N,1)
    e_d = jnp.where(adjpos_d > 0.0, _leaky_relu(s1 + s2, alpha), NEG_BIG)
    p_d = jnp.exp(e_d - m)                                            # (TB,N,1)
    inv = pl.reciprocal(denom, approx=True)                           # EUP vrcp
    inv = inv * (2.0 - denom * inv)                                   # Newton
    return p_d * inv


def _gat_fused_kernel(h_ref, wcat_ref, wocat_ref, adjpos_ref, adjd_ref,
                      out_ref, *, alpha, nheads, nhid, tb, n):
    # h_ref     : (TB*N, Fin)          batched node features (TB instances)
    # wcat_ref  : (Fin, Ftot + 2H)     [W_all | W_all @ a_all]  (fused matmul)
    # wocat_ref : (Ftot, NC_PAD + 2)   [W_out zero-padded to 128 | W_out@a_out]
    # adjpos_ref: (N, N)               1.0 where adj > 0 else 0.0
    # adjd_ref  : (N, 1)               its diagonal
    # out_ref   : (TB*N, NC_PAD)       lane-dense output block
    ftot = nheads * nhid
    tbn = tb * n
    nc_pad = out_ref.shape[1]

    adjpos = adjpos_ref[...]
    adjd = adjd_ref[...]
    row = jax.lax.broadcasted_iota(jnp.int32, (n, n), 0)
    col = jax.lax.broadcasted_iota(jnp.int32, (n, n), 1)
    eye = (row == col).astype(jnp.float32)

    # ---- hidden multi-head layer: ONE fused matmul -> [Wh_allheads | s] ----
    cat = jnp.dot(h_ref[...], wcat_ref[...],
                  preferred_element_type=jnp.float32)        # (TBN, Ftot+2H)
    cat3 = cat.reshape(tb, n, ftot + 2 * nheads)             # sublane regroup
    wh3 = cat3[:, :, :ftot]                                  # (TB, N, Ftot)
    s3 = cat3[:, :, ftot:]                                   # (TB, N, 2H)

    hp = []
    for hd in range(nheads):                                 # static unroll
        attn = _diag_softmax_attn(s3[:, :, 2 * hd:2 * hd + 1],
                                  s3[:, :, 2 * hd + 1:2 * hd + 2],
                                  adjpos, adjd, eye, alpha)  # (TB, N, 1)
        hp.append(_elu(attn * wh3[:, :, hd * nhid:(hd + 1) * nhid]))
    # concat=True hidden activation, kept as a register value (no scratch).
    xc = jnp.concatenate(hp, axis=-1).reshape(tbn, ftot)     # (TBN, Ftot)

    # ---- output layer (concat=False) + the GAT-level F.elu ----------------
    cat_o = jnp.dot(xc, wocat_ref[...],
                    preferred_element_type=jnp.float32)      # (TBN, NC_PAD+2)
    wh_o = cat_o[:, :nc_pad]                                 # (TBN, NC_PAD)
    s_o3 = cat_o[:, nc_pad:].reshape(tb, n, 2)               # (TB, N, 2)
    attn_o = _diag_softmax_attn(s_o3[:, :, 0:1], s_o3[:, :, 1:2],
                                adjpos, adjd, eye, alpha)    # (TB, N, 1)
    out_ref[...] = _elu(attn_o.reshape(tbn, 1) * wh_o).astype(out_ref.dtype)


# --------------------------------------------------------------------------
# Wrapper
# --------------------------------------------------------------------------
def _pick_tb(G, N):
    """Instances per grid step.

    Aim for the LARGEST block (fewest grid steps; each step carries ~0.35us
    fixed overhead) with TB*N <= 1024 rows, preferring TB*N a multiple of 256
    (v6e/v7x MXU row width) and keeping TB*N sublane-aligned (multiple of 8)
    unless the block covers the whole array.  Per-step VMEM is linear in TB
    (the quadratic mask is gone), so 1024 rows is comfortably within every
    generation's scoped VMEM budget.
    """
    cand = [tb for tb in range(1, G + 1)
            if G % tb == 0 and tb * N <= 1024
            and ((tb * N) % 8 == 0 or tb == G)]
    if not cand:
        return G
    pref = [tb for tb in cand if (tb * N) % 256 == 0]
    return max(pref) if pref else max(cand)


def gat_forward_pallas(x, adj, params, alpha):
    """Fused GAT forward (inference; dropout is identity).

    x: (B, Fin, N, L), adj: (N, N)  ->  (B, nclass, N, L)
    """
    B, Fin, N, L = x.shape
    heads = params["heads"]
    nheads = len(heads)
    nhid = heads[0][0].shape[1]
    Ftot = nheads * nhid
    nclass = params["out_W"].shape[1]
    G = B * L
    TB = _pick_tb(G, N)
    TBN = TB * N
    # Lane-dense output width (>=128 lanes -> unmasked vst + dense writeback).
    NC_PAD = max(128, ((nclass + 127) // 128) * 128)

    f32 = jnp.float32
    # ---- parameter / mask prep (tiny one-off XLA work) --------------------
    W_all = jnp.concatenate([W for (W, _) in heads], axis=1).astype(f32)
    a_all = jax.scipy.linalg.block_diag(
        *[a.reshape(2, nhid) for (_, a) in heads]).T.astype(f32)  # (Ftot, 2H)
    # Fused weights: one matmul per layer produces [Wh | s].
    Wcat = jnp.concatenate([W_all, W_all @ a_all], axis=1)        # (Fin, Ftot+2H)

    W_out = params["out_W"].astype(f32)                           # (Ftot, nclass)
    a_out = params["out_a"].reshape(2, nclass).T.astype(f32)      # (nclass, 2)
    W_out_pad = jnp.zeros((Ftot, NC_PAD), f32).at[:, :nclass].set(W_out)
    Wocat = jnp.concatenate([W_out_pad, W_out @ a_out], axis=1)   # (Ftot, NC_PAD+2)

    # Per-instance (N, N) adjacency indicator -- linear (tiny) mask, shared
    # across all instances; replaces the old (TBN, TBN) kron'd bias.
    adjpos = (adj > 0).astype(f32)                                # (N, N)
    adjd = jnp.diag(adjpos)[:, None]                              # (N, 1)

    # One layout change for the whole network: (B,Fin,N,L) -> (B*L*N, Fin),
    # rows ordered (b, l, n) so each graph instance occupies N contiguous rows.
    hflat = jnp.transpose(x, (0, 3, 2, 1)).reshape(G * N, Fin).astype(f32)

    kernel = functools.partial(_gat_fused_kernel, alpha=alpha, nheads=nheads,
                               nhid=nhid, tb=TB, n=N)
    out = pl.pallas_call(
        kernel,
        out_shape=jax.ShapeDtypeStruct((G * N, NC_PAD), f32),
        grid=(G // TB,),
        in_specs=[
            pl.BlockSpec((TBN, Fin), lambda g: (g, 0)),
            pl.BlockSpec((Fin, Ftot + 2 * nheads), lambda g: (0, 0)),
            pl.BlockSpec((Ftot, NC_PAD + 2), lambda g: (0, 0)),
            pl.BlockSpec((N, N), lambda g: (0, 0)),
            pl.BlockSpec((N, 1), lambda g: (0, 0)),
        ],
        out_specs=pl.BlockSpec((TBN, NC_PAD), lambda g: (g, 0)),
        compiler_params=pltpu.CompilerParams(
            dimension_semantics=("parallel",)),
    )(hflat, Wcat, Wocat, adjpos, adjd)

    # (G*N, NC_PAD) -> (B, nclass, N, L)
    out = out[:, :nclass]
    return jnp.transpose(out.reshape(B, L, N, nclass), (0, 3, 2, 1)).astype(x.dtype)


# ---------------- parameter init (deterministic, xavier_uniform gain=1.414) --
def _xavier_uniform(key, shape, gain):
    fan_in, fan_out = shape[0], shape[1]
    bound = gain * np.sqrt(6.0 / (fan_in + fan_out))
    return jax.random.uniform(key, shape, jnp.float32, -bound, bound)


def init_gat_params(key, nfeat, nhid, nclass, nheads):
    keys = jax.random.split(key, 2 * nheads + 2)
    heads = []
    for h in range(nheads):
        W = _xavier_uniform(keys[2 * h], (nfeat, nhid), 1.414)
        a = _xavier_uniform(keys[2 * h + 1], (2 * nhid, 1), 1.414)
        heads.append((W, a))
    out_W = _xavier_uniform(keys[-2], (nhid * nheads, nclass), 1.414)
    out_a = _xavier_uniform(keys[-1], (2 * nclass, 1), 1.414)
    return {"heads": heads, "out_W": out_W, "out_a": out_a}


# ---------------- pure-JAX reference (mirrors the PyTorch einsums exactly) ---
def _ref_gat_layer(h, adj, W, a, alpha, concat):
    Fout = W.shape[1]
    hp = jnp.transpose(h, (0, 2, 1, 3))                       # (B, N, Fin, L)
    Wh = jnp.einsum('bnwl,wv->bnvl', hp, W)                   # (B, N, Fout, L)
    Wh1 = jnp.einsum('bnvl,vi->bnil', Wh, a[:Fout])           # (B, N, 1, L)
    Wh2 = jnp.einsum('bnvl,vi->bnil', Wh, a[Fout:])           # (B, N, 1, L)
    e = Wh1 + jnp.transpose(Wh2, (0, 2, 1, 3))                # (B, N, N, L)
    e = jnp.where(e >= 0, e, alpha * e)                       # LeakyReLU
    e = jnp.transpose(e, (0, 3, 1, 2))                        # (B, L, N, N)
    att = jnp.where(adj > 0, e, NEG_BIG)
    att = jnp.transpose(att, (0, 2, 3, 1))                    # (B, N, N, L)
    att = jax.nn.softmax(att, axis=2)
    N = att.shape[1]
    idx = jnp.arange(N)
    diag = att[:, idx, idx, :]                                # (B, N, L)
    h_prime = diag[:, :, None, :] * Wh                        # (B, N, Fout, L)
    h_prime = jnp.transpose(h_prime, (0, 2, 1, 3))            # (B, Fout, N, L)
    return jax.nn.elu(h_prime) if concat else h_prime


def ref_gat(x, adj, params, alpha):
    heads = [_ref_gat_layer(x, adj, W, a, alpha, True)
             for (W, a) in params["heads"]]
    xc = jnp.concatenate(heads, axis=1)
    return jax.nn.elu(
        _ref_gat_layer(xc, adj, params["out_W"], params["out_a"], alpha, False))


if __name__ == "__main__":
    key = jax.random.PRNGKey(0)
    B, N, L = 2, 8, 4
    nfeat, nhid, nclass, nheads = 16, 8, 4, 2
    alpha = 0.2

    k1, k2, k3 = jax.random.split(key, 3)
    x = jax.random.normal(k1, (B, nfeat, N, L), jnp.float32)
    adj = (jax.random.uniform(k2, (N, N)) > 0.5).astype(jnp.float32)
    adj = jnp.maximum(adj, jnp.eye(N, dtype=jnp.float32))   # self loops
    params = init_gat_params(k3, nfeat, nhid, nclass, nheads)

    fwd = jax.jit(functools.partial(gat_forward_pallas, alpha=alpha))
    out = jax.block_until_ready(fwd(x, adj, params))
    ref = jax.block_until_ready(ref_gat(x, adj, params, alpha))

    assert out.shape == (B, nclass, N, L)
    np.testing.assert_allclose(np.asarray(out), np.asarray(ref),
                               rtol=1e-4, atol=1e-5)
    print("KERNEL_OK")
</pallas_src>

<mosaic_0001>
module attributes {stable_mosaic.version = 11 : i64} {
  func.func @_gat_fused_kernel(%arg0: i32, %arg1: memref<64x16xf32, #tpu.memory_space<vmem>>, %arg2: memref<16x20xf32, #tpu.memory_space<vmem>>, %arg3: memref<16x130xf32, #tpu.memory_space<vmem>>, %arg4: memref<8x8xf32, #tpu.memory_space<vmem>>, %arg5: memref<8x1xf32, #tpu.memory_space<vmem>>, %arg6: memref<64x128xf32, #tpu.memory_space<vmem>>) attributes {dimension_semantics = [#tpu.dimension_semantics<parallel>], iteration_bounds = array<i64: 1>, scalar_prefetch = 0 : i64, scratch_operands = 0 : i64, tpu.core_type = #tpu.core_type<tc>, window_params = [{transform_indices = @transform_0, window_bounds = array<i64: 64, 16>}, {pipeline_mode = #tpu.pipeline_mode<synchronous>, transform_indices = @transform_1, window_bounds = array<i64: 16, 20>}, {pipeline_mode = #tpu.pipeline_mode<synchronous>, transform_indices = @transform_2, window_bounds = array<i64: 16, 130>}, {pipeline_mode = #tpu.pipeline_mode<synchronous>, transform_indices = @transform_3, window_bounds = array<i64: 8, 8>}, {pipeline_mode = #tpu.pipeline_mode<synchronous>, transform_indices = @transform_4, window_bounds = array<i64: 8, 1>}, {transform_indices = @transform_5, window_bounds = array<i64: 64, 128>}]} {
    %c0 = arith.constant 0 : index
    %c0_0 = arith.constant 0 : index
    %0 = vector.load %arg4[%c0, %c0_0] : memref<8x8xf32, #tpu.memory_space<vmem>>, vector<8x8xf32>
    %c0_1 = arith.constant 0 : index
    %c0_2 = arith.constant 0 : index
    %1 = vector.load %arg5[%c0_1, %c0_2] : memref<8x1xf32, #tpu.memory_space<vmem>>, vector<8x1xf32>
    %2 = tpu.iota {dimensions = array<i32: 0>} : vector<8x8xi32>
    %3 = tpu.iota {dimensions = array<i32: 1>} : vector<8x8xi32>
    %4 = arith.cmpi eq, %2, %3 : vector<8x8xi32>
    %5 = arith.extui %4 : vector<8x8xi1> to vector<8x8xi32>
    %6 = arith.sitofp %5 : vector<8x8xi32> to vector<8x8xf32>
    %c0_3 = arith.constant 0 : index
    %c0_4 = arith.constant 0 : index
    %7 = vector.load %arg1[%c0_3, %c0_4] : memref<64x16xf32, #tpu.memory_space<vmem>>, vector<64x16xf32>
    %c0_5 = arith.constant 0 : index
    %c0_6 = arith.constant 0 : index
    %8 = vector.load %arg2[%c0_5, %c0_6] : memref<16x20xf32, #tpu.memory_space<vmem>>, vector<16x20xf32>
    %cst = arith.constant dense<0.000000e+00> : vector<64x20xf32>
    %9 = tpu.matmul %7, %8, %cst {dimension_numbers = #tpu.dot_dimension_numbers<[1], [0], [0], [1], [0, 0, 1, 1], [], []>} : vector<64x16xf32>, vector<16x20xf32>, vector<64x20xf32> -> vector<64x20xf32>
    %10 = vector.shape_cast %9 : vector<64x20xf32> to vector<8x8x20xf32>
    %11 = vector.extract_strided_slice %10 {offsets = [0, 0, 0], sizes = [8, 8, 16], strides = [1, 1, 1]} : vector<8x8x20xf32> to vector<8x8x16xf32>
    %12 = vector.extract_strided_slice %10 {offsets = [0, 0, 16], sizes = [8, 8, 4], strides = [1, 1, 1]} : vector<8x8x20xf32> to vector<8x8x4xf32>
    %13 = vector.extract_strided_slice %12 {offsets = [0, 0, 0], sizes = [8, 8, 1], strides = [1, 1, 1]} : vector<8x8x4xf32> to vector<8x8x1xf32>
    %14 = vector.extract_strided_slice %12 {offsets = [0, 0, 1], sizes = [8, 8, 1], strides = [1, 1, 1]} : vector<8x8x4xf32> to vector<8x8x1xf32>
    %15 = vector.shape_cast %6 : vector<8x8xf32> to vector<1x8x8xf32>
    %16 = vector.broadcast %14 : vector<8x8x1xf32> to vector<8x8x8xf32>
    %17 = vector.broadcast %15 : vector<1x8x8xf32> to vector<8x8x8xf32>
    %18 = arith.mulf %16, %17 : vector<8x8x8xf32>
    %cst_7 = arith.constant dense<0.000000e+00> : vector<8x8xf32>
    %19 = vector.multi_reduction <add>, %18, %cst_7 [1] : vector<8x8x8xf32> to vector<8x8xf32>
    %20 = vector.shape_cast %19 : vector<8x8xf32> to vector<8x1x8xf32>
    %cst_8 = arith.constant 0.000000e+00 : f32
    %21 = vector.broadcast %cst_8 : f32 to vector<8x8xf32>
    %22 = arith.cmpf ogt, %0, %21 : vector<8x8xf32>
    %23 = vector.broadcast %13 : vector<8x8x1xf32> to vector<8x8x8xf32>
    %24 = vector.broadcast %20 : vector<8x1x8xf32> to vector<8x8x8xf32>
    %25 = arith.addf %23, %24 : vector<8x8x8xf32>
    %cst_9 = arith.constant 0.000000e+00 : f32
    %26 = vector.broadcast %cst_9 : f32 to vector<8x8x8xf32>
    %27 = arith.cmpf oge, %25, %26 : vector<8x8x8xf32>
    %cst_10 = arith.constant 2.000000e-01 : f32
    %28 = vector.broadcast %cst_10 : f32 to vector<8x8x8xf32>
    %29 = arith.mulf %28, %25 : vector<8x8x8xf32>
    %30 = arith.select %27, %25, %29 : vector<8x8x8xi1>, vector<8x8x8xf32>
    %cst_11 = arith.constant -9.000000e+15 : f32
    %31 = vector.shape_cast %22 : vector<8x8xi1> to vector<1x8x8xi1>
    %32 = vector.broadcast %31 : vector<1x8x8xi1> to vector<8x8x8xi1>
    %33 = vector.broadcast %cst_11 : f32 to vector<8x8x8xf32>
    %34 = arith.select %32, %30, %33 : vector<8x8x8xi1>, vector<8x8x8xf32>
    %cst_12 = arith.constant dense<0xFF800000> : vector<8x8xf32>
    %35 = vector.multi_reduction <maximumf>, %34, %cst_12 [2] : vector<8x8x8xf32> to vector<8x8xf32>
    %36 = vector.shape_cast %35 : vector<8x8xf32> to vector<8x8x1xf32>
    %37 = vector.broadcast %36 : vector<8x8x1xf32> to vector<8x8x8xf32>
    %38 = arith.subf %34, %37 : vector<8x8x8xf32>
    %39 = math.exp %38 : vector<8x8x8xf32>
    %cst_13 = arith.constant dense<0.000000e+00> : vector<8x8xf32>
    %40 = vector.multi_reduction <add>, %39, %cst_13 [2] : vector<8x8x8xf32> to vector<8x8xf32>
    %41 = vector.shape_cast %40 : vector<8x8xf32> to vector<8x8x1xf32>
    %cst_14 = arith.constant 0.000000e+00 : f32
    %42 = vector.broadcast %cst_14 : f32 to vector<8x1xf32>
    %43 = arith.cmpf ogt, %1, %42 : vector<8x1xf32>
    %44 = arith.addf %13, %14 : vector<8x8x1xf32>
    %cst_15 = arith.constant 0.000000e+00 : f32
    %45 = vector.broadcast %cst_15 : f32 to vector<8x8x1xf32>
    %46 = arith.cmpf oge, %44, %45 : vector<8x8x1xf32>
    %cst_16 = arith.constant 2.000000e-01 : f32
    %47 = vector.broadcast %cst_16 : f32 to vector<8x8x1xf32>
    %48 = arith.mulf %47, %44 : vector<8x8x1xf32>
    %49 = arith.select %46, %44, %48 : vector<8x8x1xi1>, vector<8x8x1xf32>
    %cst_17 = arith.constant -9.000000e+15 : f32
    %50 = vector.shape_cast %43 : vector<8x1xi1> to vector<1x8x1xi1>
    %51 = vector.broadcast %50 : vector<1x8x1xi1> to vector<8x8x1xi1>
    %52 = vector.broadcast %cst_17 : f32 to vector<8x8x1xf32>
    %53 = arith.select %51, %49, %52 : vector<8x8x1xi1>, vector<8x8x1xf32>
    %54 = arith.subf %53, %36 : vector<8x8x1xf32>
    %55 = math.exp %54 : vector<8x8x1xf32>
    %56 = tpu.reciprocal %41 {approx = true} : vector<8x8x1xf32> -> vector<8x8x1xf32>
    %57 = arith.mulf %41, %56 : vector<8x8x1xf32>
    %cst_18 = arith.constant 2.000000e+00 : f32
    %58 = vector.broadcast %cst_18 : f32 to vector<8x8x1xf32>
    %59 = arith.subf %58, %57 : vector<8x8x1xf32>
    %60 = arith.mulf %56, %59 : vector<8x8x1xf32>
    %61 = arith.mulf %55, %60 : vector<8x8x1xf32>
    %62 = vector.extract_strided_slice %11 {offsets = [0, 0, 0], sizes = [8, 8, 8], strides = [1, 1, 1]} : vector<8x8x16xf32> to vector<8x8x8xf32>
    %63 = vector.broadcast %61 : vector<8x8x1xf32> to vector<8x8x8xf32>
    %64 = arith.mulf %63, %62 : vector<8x8x8xf32>
    %cst_19 = arith.constant 0.000000e+00 : f32
    %65 = vector.broadcast %cst_19 : f32 to vector<8x8x8xf32>
    %66 = arith.cmpf ogt, %64, %65 : vector<8x8x8xf32>
    %cst_20 = arith.constant 0.000000e+00 : f32
    %67 = vector.broadcast %cst_20 : f32 to vector<8x8x8xf32>
    %68 = arith.minimumf %64, %67 : vector<8x8x8xf32>
    %69 = math.exp %68 : vector<8x8x8xf32>
    %cst_21 = arith.constant 1.000000e+00 : f32
    %70 = vector.broadcast %cst_21 : f32 to vector<8x8x8xf32>
    %71 = arith.subf %69, %70 : vector<8x8x8xf32>
    %72 = arith.select %66, %64, %71 : vector<8x8x8xi1>, vector<8x8x8xf32>
    %73 = vector.extract_strided_slice %12 {offsets = [0, 0, 2], sizes = [8, 8, 1], strides = [1, 1, 1]} : vector<8x8x4xf32> to vector<8x8x1xf32>
    %74 = vector.extract_strided_slice %12 {offsets = [0, 0, 3], sizes = [8, 8, 1], strides = [1, 1, 1]} : vector<8x8x4xf32> to vector<8x8x1xf32>
    %75 = vector.shape_cast %6 : vector<8x8xf32> to vector<1x8x8xf32>
    %76 = vector.broadcast %74 : vector<8x8x1xf32> to vector<8x8x8xf32>
    %77 = vector.broadcast %75 : vector<1x8x8xf32> to vector<8x8x8xf32>
    %78 = arith.mulf %76, %77 : vector<8x8x8xf32>
    %cst_22 = arith.constant dense<0.000000e+00> : vector<8x8xf32>
    %79 = vector.multi_reduction <add>, %78, %cst_22 [1] : vector<8x8x8xf32> to vector<8x8xf32>
    %80 = vector.shape_cast %79 : vector<8x8xf32> to vector<8x1x8xf32>
    %cst_23 = arith.constant 0.000000e+00 : f32
    %81 = vector.broadcast %cst_23 : f32 to vector<8x8xf32>
    %82 = arith.cmpf ogt, %0, %81 : vector<8x8xf32>
    %83 = vector.broadcast %73 : vector<8x8x1xf32> to vector<8x8x8xf32>
    %84 = vector.broadcast %80 : vector<8x1x8xf32> to vector<8x8x8xf32>
    %85 = arith.addf %83, %84 : vector<8x8x8xf32>
    %cst_24 = arith.constant 0.000000e+00 : f32
    %86 = vector.broadcast %cst_24 : f32 to vector<8x8x8xf32>
    %87 = arith.cmpf oge, %85, %86 : vector<8x8x8xf32>
    %cst_25 = arith.constant 2.000000e-01 : f32
    %88 = vector.broadcast %cst_25 : f32 to vector<8x8x8xf32>
    %89 = arith.mulf %88, %85 : vector<8x8x8xf32>
    %90 = arith.select %87, %85, %89 : vector<8x8x8xi1>, vector<8x8x8xf32>
    %cst_26 = arith.constant -9.000000e+15 : f32
    %91 = vector.shape_cast %82 : vector<8x8xi1> to vector<1x8x8xi1>
    %92 = vector.broadcast %91 : vector<1x8x8xi1> to vector<8x8x8xi1>
    %93 = vector.broadcast %cst_26 : f32 to vector<8x8x8xf32>
    %94 = arith.select %92, %90, %93 : vector<8x8x8xi1>, vector<8x8x8xf32>
    %cst_27 = arith.constant dense<0xFF800000> : vector<8x8xf32>
    %95 = vector.multi_reduction <maximumf>, %94, %cst_27 [2] : vector<8x8x8xf32> to vector<8x8xf32>
    %96 = vector.shape_cast %95 : vector<8x8xf32> to vector<8x8x1xf32>
    %97 = vector.broadcast %96 : vector<8x8x1xf32> to vector<8x8x8xf32>
    %98 = arith.subf %94, %97 : vector<8x8x8xf32>
    %99 = math.exp %98 : vector<8x8x8xf32>
    %cst_28 = arith.constant dense<0.000000e+00> : vector<8x8xf32>
    %100 = vector.multi_reduction <add>, %99, %cst_28 [2] : vector<8x8x8xf32> to vector<8x8xf32>
    %101 = vector.shape_cast %100 : vector<8x8xf32> to vector<8x8x1xf32>
    %cst_29 = arith.constant 0.000000e+00 : f32
    %102 = vector.broadcast %cst_29 : f32 to vector<8x1xf32>
    %103 = arith.cmpf ogt, %1, %102 : vector<8x1xf32>
    %104 = arith.addf %73, %74 : vector<8x8x1xf32>
    %cst_30 = arith.constant 0.000000e+00 : f32
    %105 = vector.broadcast %cst_30 : f32 to vector<8x8x1xf32>
    %106 = arith.cmpf oge, %104, %105 : vector<8x8x1xf32>
    %cst_31 = arith.constant 2.000000e-01 : f32
    %107 = vector.broadcast %cst_31 : f32 to vector<8x8x1xf32>
    %108 = arith.mulf %107, %104 : vector<8x8x1xf32>
    %109 = arith.select %106, %104, %108 : vector<8x8x1xi1>, vector<8x8x1xf32>
    %cst_32 = arith.constant -9.000000e+15 : f32
    %110 = vector.shape_cast %103 : vector<8x1xi1> to vector<1x8x1xi1>
    %111 = vector.broadcast %110 : vector<1x8x1xi1> to vector<8x8x1xi1>
    %112 = vector.broadcast %cst_32 : f32 to vector<8x8x1xf32>
    %113 = arith.select %111, %109, %112 : vector<8x8x1xi1>, vector<8x8x1xf32>
    %114 = arith.subf %113, %96 : vector<8x8x1xf32>
    %115 = math.exp %114 : vector<8x8x1xf32>
    %116 = tpu.reciprocal %101 {approx = true} : vector<8x8x1xf32> -> vector<8x8x1xf32>
    %117 = arith.mulf %101, %116 : vector<8x8x1xf32>
    %cst_33 = arith.constant 2.000000e+00 : f32
    %118 = vector.broadcast %cst_33 : f32 to vector<8x8x1xf32>
    %119 = arith.subf %118, %117 : vector<8x8x1xf32>
    %120 = arith.mulf %116, %119 : vector<8x8x1xf32>
    %121 = arith.mulf %115, %120 : vector<8x8x1xf32>
    %122 = vector.extract_strided_slice %11 {offsets = [0, 0, 8], sizes = [8, 8, 8], strides = [1, 1, 1]} : vector<8x8x16xf32> to vector<8x8x8xf32>
    %123 = vector.broadcast %121 : vector<8x8x1xf32> to vector<8x8x8xf32>
    %124 = arith.mulf %123, %122 : vector<8x8x8xf32>
    %cst_34 = arith.constant 0.000000e+00 : f32
    %125 = vector.broadcast %cst_34 : f32 to vector<8x8x8xf32>
    %126 = arith.cmpf ogt, %124, %125 : vector<8x8x8xf32>
    %cst_35 = arith.constant 0.000000e+00 : f32
    %127 = vector.broadcast %cst_35 : f32 to vector<8x8x8xf32>
    %128 = arith.minimumf %124, %127 : vector<8x8x8xf32>
    %129 = math.exp %128 : vector<8x8x8xf32>
    %cst_36 = arith.constant 1.000000e+00 : f32
    %130 = vector.broadcast %cst_36 : f32 to vector<8x8x8xf32>
    %131 = arith.subf %129, %130 : vector<8x8x8xf32>
    %132 = arith.select %126, %124, %131 : vector<8x8x8xi1>, vector<8x8x8xf32>
    %133 = tpu.concatenate %72, %132 in 2 : vector<8x8x8xf32>, vector<8x8x8xf32> -> vector<8x8x16xf32>
    %134 = vector.shape_cast %133 : vector<8x8x16xf32> to vector<64x16xf32>
    %c0_37 = arith.constant 0 : index
    %c0_38 = arith.constant 0 : index
    %135 = vector.load %arg3[%c0_37, %c0_38] : memref<16x130xf32, #tpu.memory_space<vmem>>, vector<16x130xf32>
    %cst_39 = arith.constant dense<0.000000e+00> : vector<64x130xf32>
    %136 = tpu.matmul %134, %135, %cst_39 {dimension_numbers = #tpu.dot_dimension_numbers<[1], [0], [0], [1], [0, 0, 1, 1], [], []>} : vector<64x16xf32>, vector<16x130xf32>, vector<64x130xf32> -> vector<64x130xf32>
    %137 = vector.extract_strided_slice %136 {offsets = [0, 0], sizes = [64, 128], strides = [1, 1]} : vector<64x130xf32> to vector<64x128xf32>
    %138 = vector.extract_strided_slice %136 {offsets = [0, 128], sizes = [64, 2], strides = [1, 1]} : vector<64x130xf32> to vector<64x2xf32>
    %139 = vector.shape_cast %138 : vector<64x2xf32> to vector<8x8x2xf32>
    %140 = vector.extract_strided_slice %139 {offsets = [0, 0, 0], sizes = [8, 8, 1], strides = [1, 1, 1]} : vector<8x8x2xf32> to vector<8x8x1xf32>
    %141 = vector.extract_strided_slice %139 {offsets = [0, 0, 1], sizes = [8, 8, 1], strides = [1, 1, 1]} : vector<8x8x2xf32> to vector<8x8x1xf32>
    %142 = vector.shape_cast %6 : vector<8x8xf32> to vector<1x8x8xf32>
    %143 = vector.broadcast %141 : vector<8x8x1xf32> to vector<8x8x8xf32>
    %144 = vector.broadcast %142 : vector<1x8x8xf32> to vector<8x8x8xf32>
    %145 = arith.mulf %143, %144 : vector<8x8x8xf32>
    %cst_40 = arith.constant dense<0.000000e+00> : vector<8x8xf32>
    %146 = vector.multi_reduction <add>, %145, %cst_40 [1] : vector<8x8x8xf32> to vector<8x8xf32>
    %147 = vector.shape_cast %146 : vector<8x8xf32> to vector<8x1x8xf32>
    %cst_41 = arith.constant 0.000000e+00 : f32
    %148 = vector.broadcast %cst_41 : f32 to vector<8x8xf32>
    %149 = arith.cmpf ogt, %0, %148 : vector<8x8xf32>
    %150 = vector.broadcast %140 : vector<8x8x1xf32> to vector<8x8x8xf32>
    %151 = vector.broadcast %147 : vector<8x1x8xf32> to vector<8x8x8xf32>
    %152 = arith.addf %150, %151 : vector<8x8x8xf32>
    %cst_42 = arith.constant 0.000000e+00 : f32
    %153 = vector.broadcast %cst_42 : f32 to vector<8x8x8xf32>
    %154 = arith.cmpf oge, %152, %153 : vector<8x8x8xf32>
    %cst_43 = arith.constant 2.000000e-01 : f32
    %155 = vector.broadcast %cst_43 : f32 to vector<8x8x8xf32>
    %156 = arith.mulf %155, %152 : vector<8x8x8xf32>
    %157 = arith.select %154, %152, %156 : vector<8x8x8xi1>, vector<8x8x8xf32>
    %cst_44 = arith.constant -9.000000e+15 : f32
    %158 = vector.shape_cast %149 : vector<8x8xi1> to vector<1x8x8xi1>
    %159 = vector.broadcast %158 : vector<1x8x8xi1> to vector<8x8x8xi1>
    %160 = vector.broadcast %cst_44 : f32 to vector<8x8x8xf32>
    %161 = arith.select %159, %157, %160 : vector<8x8x8xi1>, vector<8x8x8xf32>
    %cst_45 = arith.constant dense<0xFF800000> : vector<8x8xf32>
    %162 = vector.multi_reduction <maximumf>, %161, %cst_45 [2] : vector<8x8x8xf32> to vector<8x8xf32>
    %163 = vector.shape_cast %162 : vector<8x8xf32> to vector<8x8x1xf32>
    %164 = vector.broadcast %163 : vector<8x8x1xf32> to vector<8x8x8xf32>
    %165 = arith.subf %161, %164 : vector<8x8x8xf32>
    %166 = math.exp %165 : vector<8x8x8xf32>
    %cst_46 = arith.constant dense<0.000000e+00> : vector<8x8xf32>
    %167 = vector.multi_reduction <add>, %166, %cst_46 [2] : vector<8x8x8xf32> to vector<8x8xf32>
    %168 = vector.shape_cast %167 : vector<8x8xf32> to vector<8x8x1xf32>
    %cst_47 = arith.constant 0.000000e+00 : f32
    %169 = vector.broadcast %cst_47 : f32 to vector<8x1xf32>
    %170 = arith.cmpf ogt, %1, %169 : vector<8x1xf32>
    %171 = arith.addf %140, %141 : vector<8x8x1xf32>
    %cst_48 = arith.constant 0.000000e+00 : f32
    %172 = vector.broadcast %cst_48 : f32 to vector<8x8x1xf32>
    %173 = arith.cmpf oge, %171, %172 : vector<8x8x1xf32>
    %cst_49 = arith.constant 2.000000e-01 : f32
    %174 = vector.broadcast %cst_49 : f32 to vector<8x8x1xf32>
    %175 = arith.mulf %174, %171 : vector<8x8x1xf32>
    %176 = arith.select %173, %171, %175 : vector<8x8x1xi1>, vector<8x8x1xf32>
    %cst_50 = arith.constant -9.000000e+15 : f32
    %177 = vector.shape_cast %170 : vector<8x1xi1> to vector<1x8x1xi1>
    %178 = vector.broadcast %177 : vector<1x8x1xi1> to vector<8x8x1xi1>
    %179 = vector.broadcast %cst_50 : f32 to vector<8x8x1xf32>
    %180 = arith.select %178, %176, %179 : vector<8x8x1xi1>, vector<8x8x1xf32>
    %181 = arith.subf %180, %163 : vector<8x8x1xf32>
    %182 = math.exp %181 : vector<8x8x1xf32>
    %183 = tpu.reciprocal %168 {approx = true} : vector<8x8x1xf32> -> vector<8x8x1xf32>
    %184 = arith.mulf %168, %183 : vector<8x8x1xf32>
    %cst_51 = arith.constant 2.000000e+00 : f32
    %185 = vector.broadcast %cst_51 : f32 to vector<8x8x1xf32>
    %186 = arith.subf %185, %184 : vector<8x8x1xf32>
    %187 = arith.mulf %183, %186 : vector<8x8x1xf32>
    %188 = arith.mulf %182, %187 : vector<8x8x1xf32>
    %189 = vector.shape_cast %188 : vector<8x8x1xf32> to vector<64x1xf32>
    %190 = vector.broadcast %189 : vector<64x1xf32> to vector<64x128xf32>
    %191 = arith.mulf %190, %137 : vector<64x128xf32>
    %cst_52 = arith.constant 0.000000e+00 : f32
    %192 = vector.broadcast %cst_52 : f32 to vector<64x128xf32>
    %193 = arith.cmpf ogt, %191, %192 : vector<64x128xf32>
    %cst_53 = arith.constant 0.000000e+00 : f32
    %194 = vector.broadcast %cst_53 : f32 to vector<64x128xf32>
    %195 = arith.minimumf %191, %194 : vector<64x128xf32>
    %196 = math.exp %195 : vector<64x128xf32>
    %cst_54 = arith.constant 1.000000e+00 : f32
    %197 = vector.broadcast %cst_54 : f32 to vector<64x128xf32>
    %198 = arith.subf %196, %197 : vector<64x128xf32>
    %199 = arith.select %193, %191, %198 : vector<64x128xi1>, vector<64x128xf32>
    %c0_55 = arith.constant 0 : index
    %c0_56 = arith.constant 0 : index
    %200 = vector.load %arg6[%c0_55, %c0_56] : memref<64x128xf32, #tpu.memory_space<vmem>>, vector<64x128xf32>
    tpu.vector_store %arg6[%c0_55, %c0_56], %199 {strides = array<i32>} : memref<64x128xf32, #tpu.memory_space<vmem>>, vector<64x128xf32>,
    return
  }
  func.func @transform_0(%arg0: i32) -> (i32, i32) {
    %c0_i32 = arith.constant 0 : i32
    %c0_i32_0 = arith.constant 0 : i32
    return %arg0, %c0_i32 : i32, i32
  }
  func.func @transform_1(%arg0: i32) -> (i32, i32) {
    %c0_i32 = arith.constant 0 : i32
    %c0_i32_0 = arith.constant 0 : i32
    %c0_i32_1 = arith.constant 0 : i32
    return %c0_i32, %c0_i32_0 : i32, i32
  }
  func.func @transform_2(%arg0: i32) -> (i32, i32) {
    %c0_i32 = arith.constant 0 : i32
    %c0_i32_0 = arith.constant 0 : i32
    %c0_i32_1 = arith.constant 0 : i32
    return %c0_i32, %c0_i32_0 : i32, i32
  }
  func.func @transform_3(%arg0: i32) -> (i32, i32) {
    %c0_i32 = arith.constant 0 : i32
    %c0_i32_0 = arith.constant 0 : i32
    %c0_i32_1 = arith.constant 0 : i32
    return %c0_i32, %c0_i32_0 : i32, i32
  }
  func.func @transform_4(%arg0: i32) -> (i32, i32) {
    %c0_i32 = arith.constant 0 : i32
    %c0_i32_0 = arith.constant 0 : i32
    %c0_i32_1 = arith.constant 0 : i32
    return %c0_i32, %c0_i32_0 : i32, i32
  }
  func.func @transform_5(%arg0: i32) -> (i32, i32) {
    %c0_i32 = arith.constant 0 : i32
    %c0_i32_0 = arith.constant 0 : i32
    return %arg0, %c0_i32 : i32, i32
  }
}

</mosaic_0001>

<bundles_post_ra>
// kernel: gat_forward_pallas.1
= control target key start
LH: loop header
LB: loop body
LE: loop exit
PB: predicated region body
PF: predicated region fallthrough
CT: control target
= control target key end

     0   :  { %vm39_vm0 = vcmask 130048   ;;  %v2059_v3 = vmov 19   ;;  %v2060_v4 = vmov 17   ;;  %v2061_v13 = vmov 0.0   ;;  %s2065_s12 = smov 112   ;;  %s2066_s13 = smov 110   ;;  %s3023_s1 = inlined_call_operand.vmem [shape: f32[16,20], index: 1, kind: input, shape index: {}]   ;;  %s3024_s0 = inlined_call_operand.vmem [shape: f32[64,16], index: 0, kind: input, shape index: {}]   ;;  %s3025_s3 = inlined_call_operand.vmem [shape: f32[8,8], index: 3, kind: input, shape index: {}]   ;;  %s3026_s4 = inlined_call_operand.vmem [shape: f32[8,1], index: 4, kind: input, shape index: {}]   ;;  %s3027_s2 = inlined_call_operand.vmem [shape: f32[16,130], index: 2, kind: input, shape index: {}]   ;;  %s3028_s5 = inlined_call_operand.vmem [shape: f32[64,128], index: 5, kind: output, shape index: {}]  }
   0x1   :  { %v37_v0 = vld [vmem:[%s3023_s1] sm:$0xff]  ;;  %v38_v1 = vld [vmem:[%s3023_s1 + $0x8] sm:$0xff]  ;;  %1833 = vset.pattern.permute.xlu0 %v2059_v3  ;;  %1832 = vset.pattern.permute.xlu1 %v2060_v4  ;;  %v31_v7 = vld [vmem:[%s3024_s0 + $0x10] sm:$0xff]  ;;  %v2062_v17 = vmov 18   ;;  %v2063_v18 = vmov 16   ;;  %v22_v51 = vlaneseq  ;;  %vm217_vm6 = vcmask 64512  }
   0x2   :  { %v29_v2 = vld [vmem:[%s3024_s0] sm:$0xff]  ;;  %v1812_v5 = vpack.c.bf16 %v38_v1, %v37_v0  ;;  %v30_v6 = vld [vmem:[%s3024_s0 + $0x8] sm:$0xff]  ;;  %v32_v8 = vld [vmem:[%s3024_s0 + $0x18] sm:$0xff]  ;;  %1224 = vmatprep.mubr.f32.mxu1 %v2061_v13 }
   0x3   :  { %1800 = vmatprep.mubr.msk.f32.mxu0 %vm39_vm0, %v29_v2  ;;  %v33_v9 = vld [vmem:[%s3024_s0 + $0x20] sm:$0xff]  ;;  %v34_v10 = vld [vmem:[%s3024_s0 + $0x28] sm:$0xff]  ;;  %v35_v11 = vld [vmem:[%s3024_s0 + $0x30] sm:$0xff]  ;;  %v23_v54 = vshrl.u32 %v22_v51, 7  ;;  %v25_v55 = vand.u32 127, %v22_v51 }
   0x4   :  { %1813 = vmatprep.subr.bf16.mxu0 %v1812_v5  ;;  %v36_v12 = vld [vmem:[%s3024_s0 + $0x38] sm:$0xff]  ;;  %s2064_s0 = smov 127  }
   0x5   :  { %1815 = vmatpush3.bf16.msra.mxu0 %v1812_v5  ;;  %vm26_vm4 = vcmp.eq.s32.totalorder %v23_v54, %v25_v55 }
   0x6   :  { %v2267_v59 = vsel %vm26_vm4, 1.0, %v2061_v13 }
   0x8   :  { %1801 = vmatmul.mubr.msk.f32.vlgmr.msra.gmra.mrb[0].mxu0 %vm39_vm0, %v30_v6 }
   0x9   :  { %1803 = vmatprep.mubr.msk.f32.mxu0 %vm39_vm0, %v31_v7 }
   0xc   :  { %1804 = vmatmul.mubr.msk.f32.gmra.mrb[2].mxu0 %vm39_vm0, %v32_v8 }
   0xd   :  { %1806 = vmatprep.mubr.msk.f32.mxu0 %vm39_vm0, %v33_v9 }
  0x10   :  { %1807 = vmatmul.mubr.msk.f32.gmra.mrb[4].mxu0 %vm39_vm0, %v34_v10 }
  0x11   :  { %1809 = vmatprep.mubr.msk.f32.mxu0 %vm39_vm0, %v35_v11 }
  0x14   :  { %1810 = vmatmul.mubr.msk.f32.gmra.mrb[6].mxu0 %vm39_vm0, %v36_v12 }
  0x15   :  { %1212 = vmatprep.mubr.f32.mxu0 %v2061_v13 }
  0xdb   :  { %v2141_v14 = vpop.f32.mrb[0].mxu0 }
  0xdc   :  { %685 = vperm.xlu0 %1833, %v2141_v14   ;;  %176 = vperm.xlu1 %1832, %v2141_v14   ;;  %v2145_v15 = vpop.f32.mrb[1].mxu0 }
  0xdf   :  { %v2147_v16 = vpop.f32.mrb[2].mxu0 }
  0xe0   :  { %1835 = vset.pattern.permute.xlu0 %v2062_v17  ;;  %1834 = vset.pattern.permute.xlu1 %v2063_v18  ;;  %v2150_v19 = vpop.f32.mrb[3].mxu0 }
  0xe1   :  { %781 = vperm.xlu0 %1835, %v2141_v14   ;;  %280 = vperm.xlu1 %1834, %v2141_v14  }
  0xe3   :  { %v2154_v20 = vpop.f32.mrb[4].mxu0 }
  0xe4   :  { %v2156_v21 = vpop.f32.mrb[5].mxu0 }
  0xe5   :  { %424 = vrot.lane.b32.xlu0 %v2141_v14, %s2064_s0  ;;  %1836 = vset.pattern.permute.xlu1 %v2060_v4 }
  0xe6   :  { %171 = vperm.xlu1 %1836, %v2145_v15   ;;  %1837 = vset.pattern.permute.xlu0 %v2059_v3 }
  0xe7   :  { %v2163_v22 = vpop.f32.mrb[6].mxu0 }
  0xe8   :  { %v2165_v23 = vpop.f32.mrb[7].mxu0 }
  0xe9   :  { %681 = vperm.xlu0 %1837, %v2145_v15  }
  0xea   :  { %1839 = vset.pattern.permute.xlu1 %v2062_v17 }
  0xeb   :  { %777 = vperm.xlu1 %1839, %v2145_v15  }
  0xed   :  { %1838 = vset.pattern.permute.xlu0 %v2063_v18 }
  0xee   :  { %276 = vperm.xlu0 %1838, %v2145_v15  }
  0xef   :  { %1840 = vset.pattern.permute.xlu1 %v2060_v4 }
  0xf0   :  { %186 = vperm.xlu1 %1840, %v2147_v16  }
  0xf2   :  { %422 = vrot.lane.b32.xlu0 %v2145_v15, %s2064_s0 }
  0xf3   :  { %1843 = vset.pattern.permute.xlu0 %v2062_v17 }
  0xf4   :  { %1841 = vset.pattern.permute.xlu1 %v2059_v3 }
  0xf5   :  { %693 = vperm.xlu1 %1841, %v2147_v16  }
  0xf6   :  { %789 = vperm.xlu0 %1843, %v2147_v16  }
  0xf9   :  { %1842 = vset.pattern.permute.xlu1 %v2063_v18 }
  0xfa   :  { %428 = vrot.lane.b32.xlu0 %v2147_v16, %s2064_s0  ;;  %288 = vperm.xlu1 %1842, %v2147_v16  }
  0xfb   :  { %1844 = vset.pattern.permute.xlu0 %v2060_v4 }
  0xfe   :  { %284 = vperm.xlu1 %1842, %v2150_v19   ;;  %181 = vperm.xlu0 %1844, %v2150_v19  }
 0x102   :  { %426 = vrot.lane.b32.xlu1 %v2150_v19, %s2064_s0  ;;  %1845 = vset.pattern.permute.xlu0 %v2059_v3 }
 0x103   :  { %689 = vperm.xlu0 %1845, %v2150_v19   ;;  %1847 = vset.pattern.permute.xlu1 %v2060_v4 }
 0x106   :  { %196 = vperm.xlu1 %1847, %v2154_v20  }
 0x107   :  { %1846 = vset.pattern.permute.xlu0 %v2062_v17 }
 0x108   :  { %785 = vperm.xlu0 %1846, %v2150_v19  }
 0x10a   :  { %1849 = vset.pattern.permute.xlu1 %v2063_v18 }
 0x10b   :  { %296 = vperm.xlu1 %1849, %v2154_v20  }
 0x10c   :  { %1848 = vset.pattern.permute.xlu0 %v2059_v3 }
 0x10d   :  { %701 = vperm.xlu0 %1848, %v2154_v20  }
 0x10f   :  { %1850 = vset.pattern.permute.xlu1 %v2062_v17 }
 0x110   :  { %797 = vperm.xlu1 %1850, %v2154_v20  }
 0x111   :  { %697 = vperm.xlu0 %1848, %v2156_v21  }
 0x114   :  { %432 = vrot.lane.b32.xlu1 %v2154_v20, %s2064_s0 }
 0x115   :  { %1853 = vset.pattern.permute.xlu0 %v2062_v17  ;;  %1851 = vset.pattern.permute.xlu1 %v2060_v4 }
 0x116   :  { %793 = vperm.xlu0 %1853, %v2156_v21  }
 0x118   :  { %191 = vperm.xlu1 %1851, %v2156_v21  }
 0x11a   :  { %801 = vperm.xlu0 %1853, %v2165_v23  }
 0x11c   :  { %1852 = vset.pattern.permute.xlu1 %v2063_v18 }
 0x11d   :  { %292 = vperm.xlu1 %1852, %v2156_v21  }
 0x121   :  { %430 = vrot.lane.b32.xlu1 %v2156_v21, %s2064_s0 }
 0x122   :  { %1854 = vset.pattern.permute.xlu1 %v2060_v4 }
 0x125   :  { %206 = vperm.xlu1 %1854, %v2163_v22  }
 0x129   :  { %1855 = vset.pattern.permute.xlu1 %v2059_v3 }
 0x12a   :  { %709 = vperm.xlu1 %1855, %v2163_v22  }
 0x12e   :  { %1856 = vset.pattern.permute.xlu1 %v2063_v18 }
 0x12f   :  { %304 = vperm.xlu1 %1856, %v2163_v22  }
 0x133   :  { %1857 = vset.pattern.permute.xlu1 %v2062_v17 }
 0x134   :  { %805 = vperm.xlu1 %1857, %v2163_v22  }
 0x138   :  { %1858 = vset.pattern.permute.xlu1 %v2060_v4 }
 0x139   :  { %201 = vperm.xlu1 %1858, %v2165_v23  }
 0x13d   :  { %1859 = vset.pattern.permute.xlu1 %v2059_v3 }
 0x13e   :  { %705 = vperm.xlu1 %1859, %v2165_v23  }
 0x142   :  { %436 = vrot.lane.b32.xlu1 %v2163_v22, %s2064_s0 }
 0x143   :  { %1860 = vset.pattern.permute.xlu1 %v2063_v18 }
 0x146   :  { %300 = vperm.xlu1 %1860, %v2165_v23  }
 0x14a   :  { %434 = vrot.lane.b32.xlu1 %v2165_v23, %s2064_s0 }
 0x15b   :  { %v2225_v24 = vpop.permute.xlu0 %685  ;;  %v2227_v25 = vpop.permute.xlu1 %176 }
 0x160   :  { %v2229_v26 = vpop.permute.xlu0 %781  ;;  %v2231_v27 = vpop.permute.xlu1 %280 }
 0x164   :  { %v2233_v28 = vpop.permute.xlu0 %424 }
 0x165   :  { %v2235_v29 = vpop.permute.xlu1 %171 }
 0x168   :  { %v2237_v30 = vpop.permute.xlu0 %681 }
 0x16a   :  { %v2239_v31 = vpop.permute.xlu1 %777 }
 0x16d   :  { %v2241_v32 = vpop.permute.xlu0 %276 }
 0x16f   :  { %v187_v33 = vpop.permute.xlu1 %186 }
 0x170   :  { %v212_v61 = vmul.f32 %v2267_v59, %v187_v33 }
 0x171   :  { %v423_v34 = vpop.permute.xlu0 %422 }
 0x172   :  { %v446_v35 = vadd.f32 %v423_v34, %v2145_v15  ;;  %v239_v2 = vsel %vm217_vm6, %v212_v61, 0.0 }
 0x173   :  { %v240_v4 = vrot.slane %v239_v2, 4 }
 0x174   :  { %v694_v36 = vpop.permute.xlu1 %693  ;;  %vm454_vm1 = vcmp.ge.f32.partialorder %v446_v35, 0.0  ;;  %v462_v37 = vmul.f32 0.2, %v446_v35 }
 0x175   :  { %v2244_v38 = vpop.permute.xlu0 %789  ;;  %v715_v3 = vmul.f32 %v2267_v59, %v694_v36  ;;  %v241_v9 = vadd.f32 %v240_v4, %v239_v2 }
 0x176   :  { %v470_v39 = vsel %vm454_vm1, %v446_v35, %v462_v37 }
 0x177   :  { %488 = vrot.lane.b32.xlu0 %v470_v39, %s2065_s12  ;;  %v741_v6 = vsel %vm217_vm6, %v715_v3, 0.0  ;;  %v242_v35 = vrot.slane %v241_v9, 2 }
 0x178   :  { %v742_v10 = vrot.slane %v741_v6, 4 }
 0x179   :  { %v429_v40 = vpop.permute.xlu0 %428  ;;  %v2247_v41 = vpop.permute.xlu1 %288 }
 0x17a   :  { %v449_v42 = vadd.f32 %v2147_v16, %v429_v40  ;;  %v743_v36 = vadd.f32 %v742_v10, %v741_v6 }
 0x17b   :  { %920 = vrot.lane.b32.xlu0 %v470_v39, %s2066_s13 }
 0x17c   :  { %vm457_vm2 = vcmp.ge.f32.partialorder %v449_v42, 0.0  ;;  %v465_v43 = vmul.f32 0.2, %v449_v42 }
 0x17d   :  { %v2251_v44 = vpop.permute.xlu1 %284  ;;  %v182_v53 = vpop.permute.xlu0 %181 }
 0x17e   :  { %v473_v45 = vsel %vm457_vm2, %v449_v42, %v465_v43  ;;  %v211_v7 = vmul.f32 %v2267_v59, %v182_v53 }
 0x17f   :  { %926 = vrot.lane.b32.xlu0 %v473_v45, %s2066_s13  ;;  %494 = vrot.lane.b32.xlu1 %v473_v45, %s2065_s12  ;;  %v744_v45 = vrot.slane %v743_v36, 2 }
 0x180   :  { %v232_v12 = vsel %vm217_vm6, %v211_v7, 0.0 }
 0x181   :  { %v427_v46 = vpop.permute.xlu1 %426  ;;  %v233_v37 = vrot.slane %v232_v12, 4  ;;  %v745_v54 = vadd.f32 %v744_v45, %v743_v36 }
 0x182   :  { %v448_v47 = vadd.f32 %v427_v46, %v2150_v19  ;;  %v2264_v57 = vpop.permute.xlu0 %689  ;;  %v243_v46 = vadd.f32 %v242_v35, %v241_v9 }
 0x183   :  { %v746_v3 = vrot.slane %v745_v54, 1 }
 0x184   :  { %vm456_vm3 = vcmp.ge.f32.partialorder %v448_v47, 0.0  ;;  %v464_v48 = vmul.f32 0.2, %v448_v47  ;;  %v244_v55 = vrot.slane %v243_v46, 1 }
 0x185   :  { %v2256_v49 = vpop.permute.xlu1 %196 }
 0x186   :  { %v472_v50 = vsel %vm456_vm3, %v448_v47, %v464_v48  ;;  %v234_v47 = vadd.f32 %v233_v37, %v232_v12  ;;  %v245_v4 = vadd.f32 %v244_v55, %v243_v46  ;;  %v747_v12 = vadd.f32 %v746_v3, %v745_v54 }
 0x187   :  { %924 = vrot.lane.b32.xlu0 %v472_v50, %s2066_s13  ;;  %492 = vrot.lane.b32.xlu1 %v472_v50, %s2065_s12  ;;  %v2271_v63 = vpop.permute.xlu0 %785 }
 0x188   :  { %v811_v37 = vadd.f32 %v2244_v38, %v747_v12 }
 0x18a   :  { %v2260_v52 = vpop.permute.xlu1 %296  ;;  %vm819_vm9 = vcmp.ge.f32.partialorder %v811_v37, 0.0 }
 0x18c   :  { %v702_v8 = vpop.permute.xlu0 %701 }
 0x18d   :  { %v717_v18 = vmul.f32 %v2267_v59, %v702_v8 }
 0x18f   :  { %v2262_v56 = vpop.permute.xlu1 %797  ;;  %v755_v42 = vsel %vm217_vm6, %v717_v18, 0.0 }
 0x190   :  { %v698_v33 = vpop.permute.xlu0 %697  ;;  %v756_v48 = vrot.slane %v755_v42, 4 }
 0x191   :  { %v716_v43 = vmul.f32 %v2267_v59, %v698_v33 }
 0x193   :  { %v433_v58 = vpop.permute.xlu1 %432  ;;  %v748_v51 = vsel %vm217_vm6, %v716_v43, 0.0 }
 0x194   :  { %v451_v60 = vadd.f32 %v2154_v20, %v433_v58  ;;  %v235_v58 = vrot.slane %v234_v47, 2  ;;  %v749_v61 = vrot.slane %v748_v51, 4 }
 0x196   :  { %vm459_vm5 = vcmp.ge.f32.partialorder %v451_v60, 0.0  ;;  %v467_v62 = vmul.f32 0.2, %v451_v60  ;;  %v236_v6 = vadd.f32 %v235_v58, %v234_v47  ;;  %v750_v8 = vadd.f32 %v749_v61, %v748_v51 }
 0x197   :  { %v2273_v0 = vpop.permute.xlu1 %191 }
 0x198   :  { %v475_v1 = vsel %vm459_vm5, %v451_v60, %v467_v62  ;;  %v757_v60 = vadd.f32 %v756_v48, %v755_v42  ;;  %v237_v18 = vrot.slane %v236_v6, 1 }
 0x199   :  { %498 = vrot.lane.b32.xlu1 %v475_v1, %s2065_s12 }
 0x19a   :  { %v758_v7 = vrot.slane %v757_v60, 2 }
 0x19c   :  { %v2278_v5 = vpop.permute.xlu1 %292  ;;  %v759_v33 = vadd.f32 %v758_v7, %v757_v60 }
 0x19d   :  { %930 = vrot.lane.b32.xlu1 %v475_v1, %s2066_s13 }
 0x19e   :  { %v760_v43 = vrot.slane %v759_v33, 1 }
 0x1a0   :  { %v431_v11 = vpop.permute.xlu1 %430  ;;  %v761_v55 = vadd.f32 %v760_v43, %v759_v33 }
 0x1a1   :  { %v450_v17 = vadd.f32 %v431_v11, %v2156_v21 }
 0x1a3   :  { %vm458_vm7 = vcmp.ge.f32.partialorder %v450_v17, 0.0  ;;  %v466_v34 = vmul.f32 0.2, %v450_v17 }
 0x1a4   :  { %v207_v39 = vpop.permute.xlu1 %206 }
 0x1a5   :  { %v474_v40 = vsel %vm458_vm7, %v450_v17, %v466_v34  ;;  %v216_v53 = vmul.f32 %v2267_v59, %v207_v39  ;;  %v310_v17 = vadd.f32 %v2247_v41, %v245_v4  ;;  %v751_v34 = vrot.slane %v750_v8, 2 }
 0x1a6   :  { %928 = vrot.lane.b32.xlu0 %v474_v40, %s2066_s13  ;;  %496 = vrot.lane.b32.xlu1 %v474_v40, %s2065_s12  ;;  %v238_v40 = vadd.f32 %v237_v18, %v236_v6  ;;  %v827_v41 = vmul.f32 0.2, %v811_v37 }
 0x1a7   :  { %v267_v62 = vsel %vm217_vm6, %v216_v53, 0.0  ;;  %v326_v39 = vmul.f32 0.2, %v310_v17  ;;  %vm318_vm8 = vcmp.ge.f32.partialorder %v310_v17, 0.0  ;;  %v752_v45 = vadd.f32 %v751_v34, %v750_v8  ;;  %v2306_v53 = vld [vmem:[%s3025_s3] sm:$0xff] }
 0x1a8   :  { %v268_v9 = vrot.slane %v267_v62, 4  ;;  %v309_v54 = vadd.f32 %v2251_v44, %v238_v40  ;;  %vm274_vm10 = vcmp.gt.f32.partialorder %v2306_v53, 0.0  ;;  %v835_v7 = vsel %vm819_vm9, %v811_v37, %v827_v41 }
 0x1a9   :  { %v710_v50 = vpop.permute.xlu1 %709  ;;  %v334_v38 = vsel %vm318_vm8, %v310_v17, %v326_v39  ;;  %v753_v58 = vrot.slane %v752_v45, 1  ;;  %v813_v44 = vadd.f32 %v2262_v56, %v761_v55  ;;  %v794_v39 = vpop.permute.xlu0 %793  ;;  %v2327_v56 = vsel %vm274_vm10, %v835_v7, -9e+15 }
 0x1aa   :  { %v719_v2 = vmul.f32 %v2267_v59, %v710_v50  ;;  %v269_v35 = vadd.f32 %v268_v9, %v267_v62  ;;  %v2314_v6 = vsel %vm274_vm10, %v334_v38, -9e+15  ;;  %v325_v8 = vmul.f32 0.2, %v309_v54 }
 0x1ab   :  { %v754_v9 = vadd.f32 %v753_v58, %v752_v45  ;;  %vm317_vm11 = vcmp.ge.f32.partialorder %v309_v54, 0.0  ;;  %v358_v37 = vsel %vm217_vm6, %v2314_v6, -inf  ;;  %v829_v40 = vmul.f32 0.2, %v813_v44 }
 0x1ac   :  { %v769_v10 = vsel %vm217_vm6, %v719_v2, 0.0  ;;  %v270_v46 = vrot.slane %v269_v35, 2  ;;  %vm821_vm12 = vcmp.ge.f32.partialorder %v813_v44, 0.0  ;;  %v857_v41 = vsel %vm217_vm6, %v2327_v56, -inf }
 0x1ad   :  { %v770_v36 = vrot.slane %v769_v10, 4  ;;  %v837_v58 = vsel %vm821_vm12, %v813_v44, %v829_v40 }
 0x1ae   :  { %v2293_v1 = vpop.permute.xlu1 %304  ;;  %v271_v60 = vadd.f32 %v270_v46, %v269_v35  ;;  %v713_v35 = vmul.f32 %v2267_v59, %v2225_v24  ;;  %v333_v46 = vsel %vm317_vm11, %v309_v54, %v325_v8  ;;  %v2345_v44 = vsel %vm274_vm10, %v837_v58, -9e+15 }
 0x1af   :  { %v771_v48 = vadd.f32 %v770_v36, %v769_v10  ;;  %v210_v36 = vmul.f32 %v2267_v59, %v2227_v25 }
 0x1b0   :  { %v272_v10 = vrot.slane %v271_v60, 1  ;;  %v727_v25 = vsel %vm217_vm6, %v713_v35, 0.0 }
 0x1b1   :  { %v772_v62 = vrot.slane %v771_v48, 2 }
 0x1b2   :  { %v273_v43 = vadd.f32 %v272_v10, %v271_v60 }
 0x1b3   :  { %v2297_v11 = vpop.permute.xlu1 %805  ;;  %v773_v18 = vadd.f32 %v772_v62, %v771_v48 }
 0x1b4   :  { %v314_v55 = vadd.f32 %v2293_v1, %v273_v43 }
 0x1b6   :  { %v330_v1 = vmul.f32 0.2, %v314_v55  ;;  %vm322_vm15 = vcmp.ge.f32.partialorder %v314_v55, 0.0 }
 0x1b8   :  { %v202_v42 = vpop.permute.xlu1 %201 }
 0x1b9   :  { %v215_v47 = vmul.f32 %v2267_v59, %v202_v42  ;;  %v812_v42 = vadd.f32 %v794_v39, %v754_v9  ;;  %v728_v9 = vrot.slane %v727_v25, 4  ;;  %v863_v39 = vsel %vm217_vm6, %v2345_v44, -inf }
 0x1bb   :  { %v260_v50 = vsel %vm217_vm6, %v215_v47, 0.0  ;;  %v774_v47 = vrot.slane %v773_v18, 1  ;;  %v828_v38 = vmul.f32 0.2, %v812_v42  ;;  %vm820_vm13 = vcmp.ge.f32.partialorder %v812_v42, 0.0 }
 0x1bc   :  { %v261_v51 = vrot.slane %v260_v50, 4 }
 0x1bd   :  { %v706_v61 = vpop.permute.xlu1 %705  ;;  %v775_v60 = vadd.f32 %v774_v47, %v773_v18  ;;  %v836_v10 = vsel %vm820_vm13, %v812_v42, %v828_v38 }
 0x1be   :  { %v262_v2 = vadd.f32 %v261_v51, %v260_v50  ;;  %v718_v3 = vmul.f32 %v2267_v59, %v706_v61  ;;  %v225_v50 = vsel %vm217_vm6, %v210_v36, 0.0  ;;  %v2335_v51 = vsel %vm274_vm10, %v333_v46, -9e+15 }
 0x1bf   :  { %v355_v7 = vsel %vm217_vm6, %v2335_v51, -inf  ;;  %v712_v36 = vmul.f32 %v2267_v59, %v2237_v30  ;;  %v338_v46 = vsel %vm322_vm15, %v314_v55, %v330_v1 }
 0x1c0   :  { %v762_v4 = vsel %vm217_vm6, %v718_v3, 0.0  ;;  %v263_v33 = vrot.slane %v262_v2, 2  ;;  %v226_v3 = vrot.slane %v225_v50, 4 }
 0x1c1   :  { %v763_v12 = vrot.slane %v762_v4, 4  ;;  %v2317_v17 = vpop.permute.xlu1 %436 }
 0x1c2   :  { %v264_v24 = vadd.f32 %v263_v33, %v262_v2 }
 0x1c3   :  { %v764_v34 = vadd.f32 %v763_v12, %v762_v4  ;;  %v209_v4 = vmul.f32 %v2267_v59, %v2235_v29  ;;  %v815_v12 = vadd.f32 %v2297_v11, %v775_v60  ;;  %v227_v29 = vadd.f32 %v226_v3, %v225_v50  ;;  %v802_v50 = vpop.permute.xlu0 %801 }
 0x1c4   :  { %v265_v62 = vrot.slane %v264_v24, 1  ;;  %v2359_v11 = vsel %vm274_vm10, %v836_v10, -9e+15 }
 0x1c5   :  { %359 = vmax.xlane.f32.xlu0 %v358_v37  ;;  %v301_v45 = vpop.permute.xlu1 %300  ;;  %v765_v48 = vrot.slane %v764_v34, 2  ;;  %v218_v35 = vsel %vm217_vm6, %v209_v4, 0.0  ;;  %v729_v37 = vadd.f32 %v728_v9, %v727_v25  ;;  %v831_v40 = vmul.f32 0.2, %v815_v12 }
 0x1c6   :  { %v266_v33 = vadd.f32 %v265_v62, %v264_v24  ;;  %v228_v47 = vrot.slane %v227_v29, 2  ;;  %vm823_vm1 = vcmp.ge.f32.partialorder %v815_v12, 0.0  ;;  %v720_v24 = vsel %vm217_vm6, %v712_v36, 0.0 }
 0x1c7   :  { %v766_v61 = vadd.f32 %v765_v48, %v764_v34  ;;  %v219_v48 = vrot.slane %v218_v35, 4  ;;  %v860_v30 = vsel %vm217_vm6, %v2359_v11, -inf  ;;  %v714_v25 = vmul.f32 %v2267_v59, %v2264_v57 }
 0x1c8   :  { %v313_v43 = vadd.f32 %v301_v45, %v266_v33  ;;  %v730_v38 = vrot.slane %v729_v37, 2  ;;  %v839_v55 = vsel %vm823_vm1, %v815_v12, %v831_v40  ;;  %v229_v58 = vadd.f32 %v228_v47, %v227_v29 }
 0x1c9   :  { %858 = vmax.xlane.f32.xlu0 %v857_v41  ;;  %v435_v54 = vpop.permute.xlu1 %434  ;;  %v767_v18 = vrot.slane %v766_v61, 1  ;;  %v2368_v41 = vsel %vm274_vm10, %v338_v46, -9e+15  ;;  %v220_v60 = vadd.f32 %v219_v48, %v218_v35  ;;  %v214_v57 = vmul.f32 %v2267_v59, %v2256_v49 }
 0x1ca   :  { %v452_v2 = vadd.f32 %v435_v54, %v2165_v23  ;;  %v329_v45 = vmul.f32 0.2, %v313_v43  ;;  %vm321_vm2 = vcmp.ge.f32.partialorder %v313_v43, 0.0  ;;  %v370_v62 = vsel %vm217_vm6, %v2368_v41, -inf }
 0x1cb   :  { %v768_v42 = vadd.f32 %v767_v18, %v766_v61  ;;  %v721_v61 = vrot.slane %v720_v24, 4  ;;  %v2377_v3 = vsel %vm274_vm10, %v839_v55, -9e+15  ;;  %v731_v4 = vadd.f32 %v730_v38, %v729_v37 }
 0x1cc   :  { %vm460_vm14 = vcmp.ge.f32.partialorder %v452_v2, 0.0  ;;  %v468_v8 = vmul.f32 0.2, %v452_v2  ;;  %v230_v9 = vrot.slane %v229_v58, 1  ;;  %v221_v1 = vrot.slane %v220_v60, 2 }
 0x1cd   :  { %356 = vmax.xlane.f32.xlu0 %v355_v7  ;;  %v814_v54 = vadd.f32 %v802_v50, %v768_v42  ;;  %v337_v7 = vsel %vm321_vm2, %v313_v43, %v329_v45  ;;  %v722_v10 = vadd.f32 %v721_v61, %v720_v24  ;;  %v869_v18 = vsel %vm217_vm6, %v2377_v3, -inf }
 0x1ce   :  { %v2348_v34 = vsel %vm460_vm14, %v452_v2, %v468_v8  ;;  %v734_v2 = vsel %vm217_vm6, %v714_v25, 0.0  ;;  %v253_v33 = vsel %vm217_vm6, %v214_v57, 0.0  ;;  %v213_v49 = vmul.f32 %v2267_v59, %v2273_v0 }
 0x1cf   :  { %500 = vrot.lane.b32.xlu1 %v2348_v34, %s2065_s12  ;;  %v830_v8 = vmul.f32 0.2, %v814_v54  ;;  %vm822_vm3 = vcmp.ge.f32.partialorder %v814_v54, 0.0  ;;  %v735_v12 = vrot.slane %v734_v2, 4  ;;  %v2386_v29 = vsel %vm274_vm10, %v337_v7, -9e+15 }
 0x1d0   :  { %v732_v36 = vrot.slane %v731_v4, 1  ;;  %v723_v37 = vrot.slane %v722_v10, 2  ;;  %v222_v40 = vadd.f32 %v221_v1, %v220_v60  ;;  %v254_v43 = vrot.slane %v253_v33, 4 }
 0x1d1   :  { %864 = vmax.xlane.f32.xlu0 %v863_v39  ;;  %v838_v35 = vsel %vm822_vm3, %v814_v54, %v830_v8  ;;  %v231_v39 = vadd.f32 %v230_v9, %v229_v58  ;;  %v736_v42 = vadd.f32 %v735_v12, %v734_v2  ;;  %v367_v46 = vsel %vm217_vm6, %v2386_v29, -inf }
 0x1d2   :  { %v246_v47 = vsel %vm217_vm6, %v213_v49, 0.0  ;;  %v2393_v0 = vsel %vm274_vm10, %v838_v35, -9e+15  ;;  %v733_v48 = vadd.f32 %v732_v36, %v731_v4  ;;  %v223_v25 = vrot.slane %v222_v40, 1 }
 0x1d3   :  { %v308_v24 = vadd.f32 %v2231_v27, %v231_v39  ;;  %v737_v50 = vrot.slane %v736_v42, 2  ;;  %v255_v38 = vadd.f32 %v254_v43, %v253_v33  ;;  %v247_v45 = vrot.slane %v246_v47, 4 }
 0x1d4   :  { %v866_v55 = vsel %vm217_vm6, %v2393_v0, -inf  ;;  %v809_v54 = vadd.f32 %v2229_v26, %v733_v48  ;;  %v224_v60 = vadd.f32 %v223_v25, %v222_v40 }
 0x1d5   :  { %861 = vmax.xlane.f32.xlu0 %v860_v30  ;;  %v724_v30 = vadd.f32 %v723_v37, %v722_v10  ;;  %v324_v58 = vmul.f32 0.2, %v308_v24  ;;  %vm316_vm4 = vcmp.ge.f32.partialorder %v308_v24, 0.0  ;;  %v738_v2 = vadd.f32 %v737_v50, %v736_v42 }
 0x1d6   :  { %v248_v57 = vadd.f32 %v247_v45, %v246_v47  ;;  %v825_v4 = vmul.f32 0.2, %v809_v54  ;;  %v307_v27 = vadd.f32 %v2241_v32, %v224_v60  ;;  %vm817_vm5 = vcmp.ge.f32.partialorder %v809_v54, 0.0 }
 0x1d7   :  { %v725_v61 = vrot.slane %v724_v30, 1  ;;  %v332_v7 = vsel %vm316_vm4, %v308_v24, %v324_v58  ;;  %v739_v9 = vrot.slane %v738_v2, 1  ;;  %v447_v32 = vadd.f32 %v2141_v14, %v2233_v28 }
 0x1d8   :  { %v249_v10 = vrot.slane %v248_v57, 2  ;;  %v323_v12 = vmul.f32 0.2, %v307_v27  ;;  %v2402_v26 = vsel %vm274_vm10, %v332_v7, -9e+15  ;;  %vm315_vm7 = vcmp.ge.f32.partialorder %v307_v27, 0.0 }
 0x1d9   :  { %371 = vmax.xlane.f32.xlu0 %v370_v62  ;;  %v256_v62 = vrot.slane %v255_v38, 2  ;;  %v726_v8 = vadd.f32 %v725_v61, %v724_v30  ;;  %v740_v49 = vadd.f32 %v739_v9, %v738_v2  ;;  %v352_v39 = vsel %vm217_vm6, %v2402_v26, -inf }
 0x1da   :  { %v250_v36 = vadd.f32 %v249_v10, %v248_v57  ;;  %v331_v40 = vsel %vm315_vm7, %v307_v27, %v323_v12  ;;  %v463_v48 = vmul.f32 0.2, %v447_v32  ;;  %vm455_vm9 = vcmp.ge.f32.partialorder %v447_v32, 0.0 }
 0x1db   :  { %v257_v1 = vadd.f32 %v256_v62, %v255_v38  ;;  %v808_v33 = vadd.f32 %v2239_v31, %v726_v8  ;;  %v810_v43 = vadd.f32 %v2271_v63, %v740_v49  ;;  %v2418_v28 = vsel %vm274_vm10, %v331_v40, -9e+15 }
 0x1dc   :  { %v251_v31 = vrot.slane %v250_v36, 1  ;;  %v2421_v63 = vsel %vm455_vm9, %v447_v32, %v463_v48  ;;  %v349_v38 = vsel %vm217_vm6, %v2418_v28, -inf  ;;  %v453_v8 = vadd.f32 %v2163_v22, %v2317_v17 }
 0x1dd   :  { %870 = vmax.xlane.f32.xlu0 %v869_v18  ;;  %v833_v18 = vsel %vm817_vm5, %v809_v54, %v825_v4  ;;  %v258_v35 = vrot.slane %v257_v1, 1  ;;  %v824_v42 = vmul.f32 0.2, %v808_v33  ;;  %vm816_vm8 = vcmp.ge.f32.partialorder %v808_v33, 0.0 }
 0x1de   :  { %v2411_v37 = vsel %vm274_vm10, %v833_v18, -9e+15  ;;  %v826_v24 = vmul.f32 0.2, %v810_v43  ;;  %v252_v25 = vadd.f32 %v251_v31, %v250_v36  ;;  %vm818_vm11 = vcmp.ge.f32.partialorder %v810_v43, 0.0 }
 0x1df   :  { %v851_v47 = vsel %vm217_vm6, %v2411_v37, -inf  ;;  %v832_v50 = vsel %vm816_vm8, %v808_v33, %v824_v42  ;;  %v469_v9 = vmul.f32 0.2, %v453_v8  ;;  %vm461_vm14 = vcmp.ge.f32.partialorder %v453_v8, 0.0 }
 0x1e0   :  { %v2429_v45 = vsel %vm274_vm10, %v832_v50, -9e+15  ;;  %v311_v54 = vadd.f32 %v2278_v5, %v252_v25 }
 0x1e1   :  { %368 = vmax.xlane.f32.xlu0 %v367_v46  ;;  %v259_v46 = vadd.f32 %v258_v35, %v257_v1  ;;  %v848_v58 = vsel %vm217_vm6, %v2429_v45, -inf  ;;  %v2456_v1 = vsel %vm461_vm14, %v453_v8, %v469_v9 }
 0x1e2   :  { %v327_v61 = vmul.f32 0.2, %v311_v54  ;;  %vm319_vm13 = vcmp.ge.f32.partialorder %v311_v54, 0.0 }
 0x1e3   :  { %v312_v30 = vadd.f32 %v2260_v52, %v259_v46  ;;  %v834_v52 = vsel %vm818_vm11, %v810_v43, %v826_v24 }
 0x1e4   :  { %v2436_v60 = vsel %vm274_vm10, %v834_v52, -9e+15  ;;  %v335_v57 = vsel %vm319_vm13, %v311_v54, %v327_v61 }
 0x1e5   :  { %867 = vmax.xlane.f32.xlu0 %v866_v55  ;;  %v328_v55 = vmul.f32 0.2, %v312_v30  ;;  %vm320_vm12 = vcmp.ge.f32.partialorder %v312_v30, 0.0  ;;  %v854_v2 = vsel %vm217_vm6, %v2436_v60, -inf  ;;  %v2448_v27 = vsel %vm274_vm10, %v335_v57, -9e+15 }
 0x1e6   :  { %v361_v7 = vsel %vm217_vm6, %v2448_v27, -inf }
 0x1e7   :  { %v336_v62 = vsel %vm320_vm12, %v312_v30, %v328_v55 }
 0x1e8   :  { %v2442_v5 = vsel %vm274_vm10, %v336_v62, -9e+15 }
 0x1e9   :  { %v364_v4 = vsel %vm217_vm6, %v2442_v5, -inf  ;;  %v2460_v10 = vpop.permute.xlu0 %488 }
 0x1ed   :  { %v2462_v12 = vpop.permute.xlu0 %920 }
 0x1f1   :  { %v2464_v18 = vpop.permute.xlu0 %926  ;;  %v2491_v25 = vpop.permute.xlu1 %494 }
 0x1f3   :  { %353 = vmax.xlane.f32.xlu1 %v352_v39 }
 0x1f7   :  { %852 = vmax.xlane.f32.xlu1 %v851_v47 }
 0x1f9   :  { %v2466_v33 = vpop.permute.xlu0 %924  ;;  %v2498_v52 = vpop.permute.xlu1 %492 }
 0x1fb   :  { %490 = vrot.lane.b32.xlu0 %v2421_v63, %s2065_s12  ;;  %350 = vmax.xlane.f32.xlu1 %v349_v38 }
 0x1ff   :  { %849 = vmax.xlane.f32.xlu1 %v848_v58 }
 0x203   :  { %855 = vmax.xlane.f32.xlu1 %v854_v2 }
 0x207   :  { %365 = vmax.xlane.f32.xlu1 %v364_v4 }
 0x20b   :  { %362 = vmax.xlane.f32.xlu1 %v361_v7  ;;  %v2505_v57 = vpop.permute.xlu1 %498 }
 0x218   :  { %v2468_v49 = vpop.permute.xlu0 %928 }
 0x21c   :  { %932 = vrot.lane.b32.xlu1 %v2348_v34, %s2066_s13 }
 0x220   :  { %502 = vrot.lane.b32.xlu1 %v2456_v1, %s2065_s12 }
 0x252   :  { %v2470_v17 = vpop.xlane.xlu0 %359 }
 0x253   :  { %v376_v34 = vsub.f32 %v2314_v6, %v2470_v17 }
 0x255   :  { %v387_v35 = vmul.f32 1.442695, %v376_v34 }
 0x256   :  { %v2474_v36 = vpop.xlane.xlu0 %858 }
 0x257   :  { %1867 = vpow2.f32 %v387_v35  ;;  %v875_v32 = vsub.f32 %v2327_v56, %v2474_v36 }
 0x259   :  { %v886_v39 = vmul.f32 1.442695, %v875_v32  ;;  %v2517_v32 = vpop.permute.xlu1 %930 }
 0x25a   :  { %v2478_v40 = vpop.xlane.xlu0 %356 }
 0x25b   :  { %1869 = vpow2.f32 %v886_v39  ;;  %v375_v42 = vsub.f32 %v2335_v51, %v2478_v40 }
 0x25d   :  { %v385_v43 = vmul.f32 1.442695, %v375_v42 }
 0x25e   :  { %v2482_v46 = vpop.xlane.xlu0 %864 }
 0x25f   :  { %1871 = vpow2.f32 %v385_v43  ;;  %v877_v6 = vsub.f32 %v2345_v44, %v2482_v46 }
 0x261   :  { %v1868_v31 = vpop.eup %1867  ;;  %v890_v47 = vmul.f32 1.442695, %v877_v6 }
 0x262   :  { %v2486_v48 = vpop.xlane.xlu0 %861  ;;  %v406_v56 = vsel %vm217_vm6, %v1868_v31, 0.0 }
 0x263   :  { %1873 = vpow2.f32 %v890_v47  ;;  %v876_v24 = vsub.f32 %v2359_v11, %v2486_v48  ;;  %407 = vadd.xlane.f32.xlu0 %v406_v56 }
 0x265   :  { %v1870_v30 = vpop.eup %1869  ;;  %v888_v51 = vmul.f32 1.442695, %v876_v24 }
 0x266   :  { %v2493_v50 = vpop.xlane.xlu0 %371  ;;  %v905_v38 = vsel %vm217_vm6, %v1870_v30, 0.0 }
 0x267   :  { %1875 = vpow2.f32 %v888_v51  ;;  %v380_v44 = vsub.f32 %v2368_v41, %v2493_v50  ;;  %906 = vadd.xlane.f32.xlu0 %v905_v38 }
 0x269   :  { %v1872_v55 = vpop.eup %1871  ;;  %v395_v54 = vmul.f32 1.442695, %v380_v44 }
 0x26a   :  { %v2500_v58 = vpop.xlane.xlu0 %870  ;;  %v403_v11 = vsel %vm217_vm6, %v1872_v55, 0.0 }
 0x26b   :  { %1877 = vpow2.f32 %v395_v54  ;;  %v879_v61 = vsub.f32 %v2377_v3, %v2500_v58  ;;  %404 = vadd.xlane.f32.xlu0 %v403_v11 }
 0x26d   :  { %v1874_v62 = vpop.eup %1873  ;;  %v894_v2 = vmul.f32 1.442695, %v879_v61 }
 0x26e   :  { %v2507_v4 = vpop.xlane.xlu0 %368  ;;  %v911_v41 = vsel %vm217_vm6, %v1874_v62, 0.0 }
 0x26f   :  { %1879 = vpow2.f32 %v894_v2  ;;  %v379_v7 = vsub.f32 %v2386_v29, %v2507_v4  ;;  %912 = vadd.xlane.f32.xlu0 %v911_v41  ;;  %v2520_v29 = vpop.permute.xlu1 %496  ;;  %v2067_v2 = vmov 0  }
 0x270   :  { %1862 = vset.pattern.permute.xlu0 %v2067_v2  ;;  %1861 = vset.pattern.permute.xlu1 %v2067_v2 }
 0x271   :  { %v1876_v8 = vpop.eup %1875  ;;  %v393_v9 = vmul.f32 1.442695, %v379_v7 }
 0x272   :  { %v2512_v34 = vpop.xlane.xlu0 %867  ;;  %v908_v3 = vsel %vm217_vm6, %v1876_v8, 0.0 }
 0x273   :  { %1881 = vpow2.f32 %v393_v9  ;;  %v878_v35 = vsub.f32 %v2393_v0, %v2512_v34  ;;  %909 = vadd.xlane.f32.xlu0 %v908_v3  ;;  %v2523_v47 = vpop.permute.xlu1 %500 }
 0x275   :  { %v1878_v39 = vpop.eup %1877  ;;  %v892_v42 = vmul.f32 1.442695, %v878_v35 }
 0x276   :  { %v418_v43 = vsel %vm217_vm6, %v1878_v39, 0.0 }
 0x277   :  { %1883 = vpow2.f32 %v892_v42  ;;  %419 = vadd.xlane.f32.xlu0 %v418_v43 }
 0x279   :  { %v1880_v6 = vpop.eup %1879 }
 0x27a   :  { %v917_v31 = vsel %vm217_vm6, %v1880_v6, 0.0 }
 0x27b   :  { %918 = vadd.xlane.f32.xlu0 %v917_v31 }
 0x27d   :  { %v1882_v56 = vpop.eup %1881 }
 0x27e   :  { %v415_v0 = vsel %vm217_vm6, %v1882_v56, 0.0 }
 0x27f   :  { %416 = vadd.xlane.f32.xlu0 %v415_v0 }
 0x280   :  { %v2526_v24 = vpop.xlane.xlu1 %353 }
 0x281   :  { %v1884_v30 = vpop.eup %1883  ;;  %v374_v51 = vsub.f32 %v2402_v26, %v2526_v24 }
 0x282   :  { %v914_v38 = vsel %vm217_vm6, %v1884_v30, 0.0 }
 0x283   :  { %v383_v44 = vmul.f32 1.442695, %v374_v51  ;;  %915 = vadd.xlane.f32.xlu0 %v914_v38 }
 0x284   :  { %v2531_v55 = vpop.xlane.xlu1 %852 }
 0x285   :  { %1885 = vpow2.f32 %v383_v44  ;;  %v873_v54 = vsub.f32 %v2411_v37, %v2531_v55 }
 0x287   :  { %v882_v11 = vmul.f32 1.442695, %v873_v54 }
 0x288   :  { %v2535_v61 = vpop.xlane.xlu1 %350 }
 0x289   :  { %1887 = vpow2.f32 %v882_v11  ;;  %v373_v62 = vsub.f32 %v2418_v28, %v2535_v61 }
 0x28b   :  { %v381_v26 = vmul.f32 1.442695, %v373_v62 }
 0x28c   :  { %v2541_v41 = vpop.xlane.xlu1 %849 }
 0x28d   :  { %1889 = vpow2.f32 %v381_v26  ;;  %v872_v7 = vsub.f32 %v2429_v45, %v2541_v41  ;;  %v2573_v26 = vld [vmem:[%s3026_s4] sm:$0xff] }
 0x28e   :  { %vm421_vm15 = vcmp.gt.f32.partialorder %v2573_v26, 0.0 }
 0x28f   :  { %v1886_v37 = vpop.eup %1885  ;;  %v880_v8 = vmul.f32 1.442695, %v872_v7 }
 0x290   :  { %v2545_v9 = vpop.xlane.xlu1 %855  ;;  %v400_v3 = vsel %vm217_vm6, %v1886_v37, 0.0  ;;  %v947_v37 = vsel %vm421_vm15, %v2464_v18, -9e+15 }
 0x291   :  { %1891 = vpow2.f32 %v880_v8  ;;  %v874_v28 = vsub.f32 %v2436_v60, %v2545_v9  ;;  %401 = vadd.xlane.f32.xlu1 %v400_v3  ;;  %v955_v8 = vsub.f32 %v947_v37, %v2474_v36 }
 0x293   :  { %v1888_v35 = vpop.eup %1887  ;;  %v884_v39 = vmul.f32 1.442695, %v874_v28  ;;  %v966_v28 = vmul.f32 1.442695, %v955_v8 }
 0x294   :  { %v2550_v42 = vpop.xlane.xlu1 %365  ;;  %v899_v43 = vsel %vm217_vm6, %v1888_v35, 0.0 }
 0x295   :  { %1893 = vpow2.f32 %v884_v39  ;;  %v378_v45 = vsub.f32 %v2442_v5, %v2550_v42  ;;  %900 = vadd.xlane.f32.xlu1 %v899_v43 }
 0x297   :  { %v1890_v6 = vpop.eup %1889  ;;  %v391_v31 = vmul.f32 1.442695, %v378_v45  ;;  %v949_v45 = vsel %vm421_vm15, %v2517_v32, -9e+15 }
 0x298   :  { %v2555_v56 = vpop.xlane.xlu1 %362  ;;  %v397_v0 = vsel %vm217_vm6, %v1890_v6, 0.0  ;;  %v957_v36 = vsub.f32 %v949_v45, %v2482_v46 }
 0x299   :  { %1895 = vpow2.f32 %v391_v31  ;;  %v377_v60 = vsub.f32 %v2448_v27, %v2555_v56  ;;  %922 = vrot.lane.b32.xlu0 %v2421_v63, %s2066_s13  ;;  %398 = vadd.xlane.f32.xlu1 %v397_v0  ;;  %v2568_v63 = vpop.permute.xlu0 %490 }
 0x29b   :  { %v1892_v30 = vpop.eup %1891  ;;  %v389_v51 = vmul.f32 1.442695, %v377_v60 }
 0x29c   :  { %v896_v38 = vsel %vm217_vm6, %v1892_v30, 0.0  ;;  %v933_v39 = vpop.permute.xlu1 %932 }
 0x29d   :  { %1897 = vpow2.f32 %v389_v51  ;;  %897 = vadd.xlane.f32.xlu1 %v896_v38 }
 0x29f   :  { %v1894_v5 = vpop.eup %1893 }
 0x2a0   :  { %v902_v44 = vsel %vm217_vm6, %v1894_v5, 0.0  ;;  %v503_v31 = vpop.permute.xlu1 %502 }
 0x2a1   :  { %903 = vadd.xlane.f32.xlu1 %v902_v44  ;;  %v519_v30 = vsel %vm421_vm15, %v503_v31, -9e+15  ;;  %v950_v31 = vsel %vm421_vm15, %v933_v39, -9e+15 }
 0x2a2   :  { %v527_v44 = vsub.f32 %v519_v30, %v2493_v50  ;;  %v518_v50 = vsel %vm421_vm15, %v2523_v47, -9e+15  ;;  %v958_v47 = vsub.f32 %v950_v31, %v2512_v34 }
 0x2a3   :  { %v1896_v54 = vpop.eup %1895 }
 0x2a4   :  { %v412_v11 = vsel %vm217_vm6, %v1896_v54, 0.0  ;;  %v542_v8 = vmul.f32 1.442695, %v527_v44 }
 0x2a5   :  { %413 = vadd.xlane.f32.xlu1 %v412_v11 }
 0x2a7   :  { %v1898_v62 = vpop.eup %1897 }
 0x2a8   :  { %v409_v27 = vsel %vm217_vm6, %v1898_v62, 0.0 }
 0x2a9   :  { %410 = vadd.xlane.f32.xlu1 %v409_v27 }
 0x2ba   :  { %934 = vrot.lane.b32.xlu1 %v2456_v1, %s2066_s13  ;;  %v514_v1 = vsel %vm421_vm15, %v2498_v52, -9e+15  ;;  %v948_v52 = vsel %vm421_vm15, %v2468_v49, -9e+15 }
 0x2bb   :  { %v522_v35 = vsub.f32 %v514_v1, %v2478_v40  ;;  %v970_v40 = vmul.f32 1.442695, %v957_v36  ;;  %v956_v60 = vsub.f32 %v948_v52, %v2486_v48  ;;  %v526_v36 = vsub.f32 %v518_v50, %v2507_v4 }
 0x2bd   :  { %v532_v18 = vmul.f32 1.442695, %v522_v35  ;;  %v968_v5 = vmul.f32 1.442695, %v956_v60 }
 0x2f0   :  { %v2575_v7 = vpop.xlane.xlu0 %407 }
 0x2f4   :  { %v907_v3 = vpop.xlane.xlu0 %906 }
 0x2f5   :  { %1899 = vrcp.f32 %v907_v3 }
 0x2f8   :  { %v405_v43 = vpop.xlane.xlu0 %404 }
 0x2f9   :  { %1901 = vrcp.f32 %v405_v43 }
 0x2fa   :  { %1903 = vpow2.f32 %v966_v28 }
 0x2fc   :  { %v913_v6 = vpop.xlane.xlu0 %912 }
 0x2fd   :  { %1905 = vrcp.f32 %v913_v6 }
 0x2fe   :  { %1907 = vpow2.f32 %v532_v18 }
 0x2ff   :  { %v1900_v0 = vpop.eup %1899 }
 0x300   :  { %v987_v32 = vmul.f32 %v1900_v0, %v907_v3  ;;  %v910_v51 = vpop.xlane.xlu0 %909 }
 0x301   :  { %1909 = vrcp.f32 %v910_v51 }
 0x302   :  { %v995_v38 = vsub.f32 2.0, %v987_v32  ;;  %1911 = vpow2.f32 %v970_v40 }
 0x303   :  { %v1902_v46 = vpop.eup %1901 }
 0x304   :  { %v1003_v54 = vmul.f32 %v1900_v0, %v995_v38  ;;  %v554_v11 = vmul.f32 %v1902_v46, %v405_v43  ;;  %v420_v49 = vpop.xlane.xlu0 %419  ;;  %v1904_v62 = vpop.eup %1903  ;;  %v540_v38 = vmul.f32 1.442695, %v526_v36 }
 0x305   :  { %1913 = vrcp.f32 %v420_v49 }
 0x306   :  { %v562_v27 = vsub.f32 2.0, %v554_v11  ;;  %v1011_v37 = vmul.f32 %v1904_v62, %v1003_v54  ;;  %1915 = vpow2.f32 %v968_v5 }
 0x307   :  { %v1906_v48 = vpop.eup %1905  ;;  %1917 = vpow2.f32 %v542_v8 }
 0x308   :  { %v570_v1 = vmul.f32 %v1902_v46, %v562_v27  ;;  %v989_v3 = vmul.f32 %v1906_v48, %v913_v6  ;;  %1033 = vperm.xlu0 %1862, %v1011_v37   ;;  %v2597_v28 = vpop.xlane.xlu0 %918  ;;  %v1908_v35 = vpop.eup %1907 }
 0x30a   :  { %v997_v45 = vsub.f32 2.0, %v989_v3  ;;  %v578_v43 = vmul.f32 %v1908_v35, %v570_v1 }
 0x30b   :  { %v1910_v18 = vpop.eup %1909 }
 0x30c   :  { %v1005_v52 = vmul.f32 %v1906_v48, %v997_v45  ;;  %v988_v0 = vmul.f32 %v1910_v18, %v910_v51  ;;  %v417_v6 = vpop.xlane.xlu0 %416  ;;  %596 = vperm.xlu0 %1862, %v578_v43   ;;  %v1912_v40 = vpop.eup %1911  ;;  %v972_v51 = vmul.f32 1.442695, %v958_v47 }
 0x30d   :  { %1919 = vrcp.f32 %v417_v6 }
 0x30e   :  { %v996_v60 = vsub.f32 2.0, %v988_v0  ;;  %v1013_v30 = vmul.f32 %v1912_v40, %v1005_v52  ;;  %v512_v52 = vsel %vm421_vm15, %v2460_v10, -9e+15  ;;  %v515_v40 = vsel %vm421_vm15, %v2491_v25, -9e+15 }
 0x30f   :  { %v1914_v32 = vpop.eup %1913  ;;  %v520_v0 = vsub.f32 %v512_v52, %v2535_v61 }
 0x310   :  { %v1004_v46 = vmul.f32 %v1910_v18, %v996_v60  ;;  %v559_v5 = vmul.f32 %v1914_v32, %v420_v49  ;;  %v916_v44 = vpop.xlane.xlu0 %915  ;;  %1043 = vperm.xlu0 %1862, %v1013_v30   ;;  %v1916_v4 = vpop.eup %1915  ;;  %v523_v60 = vsub.f32 %v515_v40, %v2470_v17 }
 0x311   :  { %1921 = vrcp.f32 %v916_v44  ;;  %v1918_v62 = vpop.eup %1917  ;;  %v528_v30 = vmul.f32 1.442695, %v520_v0 }
 0x312   :  { %v567_v54 = vsub.f32 2.0, %v559_v5  ;;  %v1012_v39 = vmul.f32 %v1916_v4, %v1004_v46  ;;  %1923 = vpow2.f32 %v540_v38  ;;  %v946_v38 = vsel %vm421_vm15, %v2466_v33, -9e+15 }
 0x313   :  { %1925 = vpow2.f32 %v972_v51  ;;  %v534_v46 = vmul.f32 1.442695, %v523_v60  ;;  %v954_v10 = vsub.f32 %v946_v38, %v2545_v9  ;;  %v517_v5 = vsel %vm421_vm15, %v2505_v57, -9e+15 }
 0x314   :  { %v575_v11 = vmul.f32 %v1914_v32, %v567_v54  ;;  %1038 = vperm.xlu0 %1862, %v1012_v39   ;;  %1927 = vrcp.f32 %v2575_v7  ;;  %v525_v4 = vsub.f32 %v517_v5, %v2550_v42  ;;  %v516_v9 = vsel %vm421_vm15, %v2520_v29, -9e+15 }
 0x316   :  { %v583_v27 = vmul.f32 %v1918_v62, %v575_v11  ;;  %v538_v57 = vmul.f32 1.442695, %v525_v4 }
 0x317   :  { %v1920_v37 = vpop.eup %1919 }
 0x318   :  { %v558_v48 = vmul.f32 %v1920_v37, %v417_v6  ;;  %621 = vperm.xlu0 %1862, %v583_v27   ;;  %v944_v27 = vsel %vm421_vm15, %v2462_v12, -9e+15  ;;  %v513_v12 = vsel %vm421_vm15, %v2568_v63, -9e+15 }
 0x319   :  { %v521_v52 = vsub.f32 %v513_v12, %v2526_v24  ;;  %v1120_v12 = vld [vmem:[%s3027_s2] sm:$0xff] }
 0x31a   :  { %v566_v8 = vsub.f32 2.0, %v558_v48 }
 0x31b   :  { %v1922_v34 = vpop.eup %1921  ;;  %v530_v5 = vmul.f32 1.442695, %v521_v52 }
 0x31c   :  { %v574_v1 = vmul.f32 %v1920_v37, %v566_v8  ;;  %v990_v49 = vmul.f32 %v1922_v34, %v916_v44  ;;  %v1924_v3 = vpop.eup %1923  ;;  %v964_v44 = vmul.f32 1.442695, %v954_v10  ;;  %v952_v8 = vsub.f32 %v944_v27, %v2541_v41 }
 0x31d   :  { %v1926_v18 = vpop.eup %1925 }
 0x31e   :  { %v998_v35 = vsub.f32 2.0, %v990_v49  ;;  %v2606_v50 = vpop.xlane.xlu1 %401  ;;  %v582_v45 = vmul.f32 %v1924_v3, %v574_v1  ;;  %v1928_v47 = vpop.eup %1927  ;;  %v960_v0 = vmul.f32 1.442695, %v952_v8 }
 0x31f   :  { %v555_v25 = vmul.f32 %v1928_v47, %v2575_v7  ;;  %v524_v7 = vsub.f32 %v516_v9, %v2555_v56  ;;  %v923_v3 = vpop.permute.xlu0 %922 }
 0x320   :  { %v1006_v43 = vmul.f32 %v1922_v34, %v998_v35  ;;  %616 = vperm.xlu0 %1862, %v582_v45   ;;  %v945_v40 = vsel %vm421_vm15, %v923_v3, -9e+15  ;;  %v1123_v3 = vld [vmem:[%s3027_s2 + $0x18] sm:$0xff] }
 0x321   :  { %v563_v39 = vsub.f32 2.0, %v555_v25  ;;  %v536_v34 = vmul.f32 1.442695, %v524_v7  ;;  %v953_v25 = vsub.f32 %v945_v40, %v2531_v55 }
 0x322   :  { %v2608_v36 = vpop.xlane.xlu1 %900  ;;  %v1014_v31 = vmul.f32 %v1926_v18, %v1006_v43 }
 0x323   :  { %v571_v37 = vmul.f32 %v1928_v47, %v563_v39 }
 0x324   :  { %1048 = vperm.xlu0 %1862, %v1014_v31  }
 0x326   :  { %v399_v6 = vpop.xlane.xlu1 %398 }
 0x327   :  { %1929 = vrcp.f32 %v399_v6 }
 0x328   :  { %1931 = vpow2.f32 %v528_v30 }
 0x32a   :  { %v898_v32 = vpop.xlane.xlu1 %897 }
 0x32e   :  { %v904_v61 = vpop.xlane.xlu1 %903 }
 0x32f   :  { %1933 = vrcp.f32 %v904_v61 }
 0x330   :  { %1935 = vpow2.f32 %v534_v46 }
 0x331   :  { %v1930_v17 = vpop.eup %1929  ;;  %1937 = vrcp.f32 %v898_v32 }
 0x332   :  { %v552_v54 = vmul.f32 %v1930_v17, %v399_v6  ;;  %v414_v33 = vpop.xlane.xlu1 %413  ;;  %v1932_v62 = vpop.eup %1931 }
 0x333   :  { %1939 = vrcp.f32 %v414_v33 }
 0x334   :  { %1941 = vrcp.f32 %v2597_v28  ;;  %v560_v51 = vsub.f32 2.0, %v552_v54 }
 0x335   :  { %1943 = vpow2.f32 %v964_v44 }
 0x336   :  { %1945 = vrcp.f32 %v2606_v50  ;;  %v568_v11 = vmul.f32 %v1930_v17, %v560_v51  ;;  %v411_v42 = vpop.xlane.xlu1 %410 }
 0x337   :  { %1947 = vrcp.f32 %v411_v42 }
 0x338   :  { %v576_v29 = vmul.f32 %v1932_v62, %v568_v11  ;;  %1949 = vpow2.f32 %v538_v57  ;;  %v962_v57 = vmul.f32 1.442695, %v953_v25 }
 0x339   :  { %v1934_v48 = vpop.eup %1933  ;;  %1951 = vrcp.f32 %v2608_v36 }
 0x33a   :  { %v986_v1 = vmul.f32 %v1934_v48, %v904_v61  ;;  %586 = vperm.xlu1 %1861, %v576_v29   ;;  %v935_v56 = vpop.permute.xlu1 %934  ;;  %v1936_v49 = vpop.eup %1935  ;;  %1953 = vpow2.f32 %v536_v34 }
 0x33b   :  { %v951_v35 = vsel %vm421_vm15, %v935_v56, -9e+15  ;;  %v1938_v45 = vpop.eup %1937  ;;  %v579_v43 = vmul.f32 %v1936_v49, %v571_v37 }
 0x33c   :  { %v994_v18 = vsub.f32 2.0, %v986_v1  ;;  %v959_v41 = vsub.f32 %v951_v35, %v2500_v58  ;;  %v984_v63 = vmul.f32 %v1938_v45, %v898_v32 }
 0x33d   :  { %v1940_v31 = vpop.eup %1939 }
 0x33e   :  { %v1942_v6 = vpop.eup %1941  ;;  %v1002_v60 = vmul.f32 %v1934_v48, %v994_v18  ;;  %v557_v30 = vmul.f32 %v1940_v31, %v414_v33  ;;  %v974_v38 = vmul.f32 1.442695, %v959_v41  ;;  %601 = vperm.xlu1 %1861, %v579_v43   ;;  %v992_v33 = vsub.f32 2.0, %v984_v63  ;;  %v1122_v43 = vld [vmem:[%s3027_s2 + $0x10] sm:$0xff] }
 0x33f   :  { %v1944_v47 = vpop.eup %1943  ;;  %v991_v24 = vmul.f32 %v1942_v6, %v2597_v28  ;;  %v1818_v41 = vpack.c.bf16 %v1122_v43, %v1120_v12 }
 0x340   :  { %v1946_v46 = vpop.eup %1945  ;;  %v1010_v10 = vmul.f32 %v1944_v47, %v1002_v60  ;;  %v565_v61 = vsub.f32 2.0, %v557_v30  ;;  %1955 = vpow2.f32 %v974_v38  ;;  %v1000_v55 = vmul.f32 %v1938_v45, %v992_v33 }
 0x341   :  { %v1948_v58 = vpop.eup %1947  ;;  %1957 = vpow2.f32 %v960_v0  ;;  %v553_v54 = vmul.f32 %v1946_v46, %v2606_v50  ;;  %v999_v51 = vsub.f32 2.0, %v991_v24 }
 0x342   :  { %v573_v17 = vmul.f32 %v1940_v31, %v565_v61  ;;  %v556_v44 = vmul.f32 %v1948_v58, %v411_v42  ;;  %1028 = vperm.xlu1 %1861, %v1010_v10   ;;  %v1950_v4 = vpop.eup %1949  ;;  %1959 = vpow2.f32 %v530_v5 }
 0x343   :  { %v1952_v32 = vpop.eup %1951  ;;  %v561_v62 = vsub.f32 2.0, %v553_v54  ;;  %v1007_v42 = vmul.f32 %v1942_v6, %v999_v51  ;;  %1961 = vpow2.f32 %v962_v57 }
 0x344   :  { %v581_v9 = vmul.f32 %v1950_v4, %v573_v17  ;;  %v564_v39 = vsub.f32 2.0, %v556_v44  ;;  %v1954_v11 = vpop.eup %1953  ;;  %v985_v28 = vmul.f32 %v1952_v32, %v2608_v36  ;;  %v1121_v36 = vld [vmem:[%s3027_s2 + $0x8] sm:$0xff] }
 0x345   :  { %v569_v48 = vmul.f32 %v1946_v46, %v561_v62  ;;  %v1816_v45 = vpack.c.bf16 %v1123_v3, %v1121_v36 }
 0x346   :  { %v572_v7 = vmul.f32 %v1948_v58, %v564_v39  ;;  %611 = vperm.xlu1 %1861, %v581_v9   ;;  %v993_v8 = vsub.f32 2.0, %v985_v28 }
 0x347   :  { %1820 = vmatprep.subr.bf16.mxu1 %v1816_v45  ;;  %1817 = vmatprep.subr.bf16.mxu0 %v1816_v45 }
 0x348   :  { %v580_v27 = vmul.f32 %v1954_v11, %v572_v7  ;;  %v1001_v49 = vmul.f32 %v1952_v32, %v993_v8  ;;  %1821 = vmatpush1.bf16.msra.mxu1 %v1818_v41  ;;  %1819 = vmatpush1.bf16.msra.mxu0 %v1818_v41 }
 0x34a   :  { %v1956_v37 = vpop.eup %1955  ;;  %606 = vperm.xlu1 %1861, %v580_v27  }
 0x34b   :  { %v1958_v50 = vpop.eup %1957  ;;  %v1015_v29 = vmul.f32 %v1956_v37, %v1007_v42 }
 0x34c   :  { %v1008_v34 = vmul.f32 %v1958_v50, %v1000_v55  ;;  %v1960_v1 = vpop.eup %1959 }
 0x34d   :  { %1053 = vperm.xlu0 %1862, %v1015_v29   ;;  %v577_v56 = vmul.f32 %v1960_v1, %v569_v48  ;;  %v1962_v35 = vpop.eup %1961 }
 0x34e   :  { %1018 = vperm.xlu1 %1861, %v1008_v34   ;;  %v1009_v18 = vmul.f32 %v1962_v35, %v1001_v49 }
 0x352   :  { %591 = vperm.xlu1 %1861, %v577_v56  }
 0x356   :  { %1023 = vperm.xlu1 %1861, %v1009_v18  }
 0x387   :  { %v1034_v31 = vpop.permute.xlu0 %1033 }
 0x388   :  { %v2668_v38 = vmul.f32 %v2147_v16, %v1034_v31 }
 0x38a   :  { %v1075_v61 = vmin.f32 %v2668_v38, 0.0  ;;  %vm1067_vm4 = vcmp.gt.f32.partialorder %v2668_v38, 0.0 }
 0x38b   :  { %v597_v52 = vpop.permute.xlu0 %596 }
 0x38c   :  { %v2665_v40 = vmul.f32 %v597_v52, %v2150_v19  ;;  %v1086_v54 = vmul.f32 1.442695, %v1075_v61 }
 0x38e   :  { %v642_v47 = vmin.f32 %v2665_v40, 0.0  ;;  %vm634_vm1 = vcmp.gt.f32.partialorder %v2665_v40, 0.0 }
 0x38f   :  { %v1044_v0 = vpop.permute.xlu0 %1043 }
 0x390   :  { %v652_v58 = vmul.f32 1.442695, %v642_v47  ;;  %v2680_v25 = vmul.f32 %v2154_v20, %v1044_v0 }
 0x392   :  { %1963 = vpow2.f32 %v652_v58  ;;  %v1077_v32 = vmin.f32 %v2680_v25, 0.0  ;;  %vm1069_vm9 = vcmp.gt.f32.partialorder %v2680_v25, 0.0 }
 0x393   :  { %v1039_v6 = vpop.permute.xlu0 %1038 }
 0x394   :  { %v2676_v5 = vmul.f32 %v1039_v6, %v2156_v21  ;;  %v1090_v27 = vmul.f32 1.442695, %v1077_v32 }
 0x396   :  { %v1076_v9 = vmin.f32 %v2676_v5, 0.0  ;;  %vm1068_vm5 = vcmp.gt.f32.partialorder %v2676_v5, 0.0 }
 0x397   :  { %v622_v60 = vpop.permute.xlu0 %621 }
 0x398   :  { %v1088_v28 = vmul.f32 1.442695, %v1076_v9 }
 0x39c   :  { %v1964_v49 = vpop.eup %1963 }
 0x39d   :  { %v1756_v41 = vadd.f32 -1.0, %v1964_v49 }
 0x39f   :  { %v617_v46 = vpop.permute.xlu0 %616  ;;  %v674_v61 = vsel %vm634_vm1, %v2665_v40, %v1756_v41 }
 0x3a0   :  { %v2698_v11 = vmul.f32 %v617_v46, %v2165_v23 }
 0x3a2   :  { %vm638_vm14 = vcmp.gt.f32.partialorder %v2698_v11, 0.0 }
 0x3a3   :  { %v1049_v33 = vpop.permute.xlu0 %1048 }
 0x3a4   :  { %v2692_v57 = vmul.f32 %v1049_v33, %v2165_v23  ;;  %v646_v23 = vmin.f32 %v2698_v11, 0.0 }
 0x3a6   :  { %v1078_v37 = vmin.f32 %v2692_v57, 0.0  ;;  %v660_v45 = vmul.f32 1.442695, %v646_v23  ;;  %vm1070_vm13 = vcmp.gt.f32.partialorder %v2692_v57, 0.0 }
 0x3a8   :  { %v1092_v36 = vmul.f32 1.442695, %v1078_v37 }
 0x3b9   :  { %v587_v30 = vpop.permute.xlu1 %586 }
 0x3bd   :  { %v602_v63 = vpop.permute.xlu1 %601 }
 0x3be   :  { %v2672_v10 = vmul.f32 %v2147_v16, %v602_v63  ;;  %v2686_v16 = vmul.f32 %v587_v30, %v2145_v15 }
 0x3c0   :  { %v643_v24 = vmin.f32 %v2672_v10, 0.0  ;;  %v640_v62 = vmin.f32 %v2686_v16, 0.0  ;;  %vm635_vm3 = vcmp.gt.f32.partialorder %v2672_v10, 0.0  ;;  %vm632_vm11 = vcmp.gt.f32.partialorder %v2686_v16, 0.0 }
 0x3c1   :  { %v1029_v17 = vpop.permute.xlu1 %1028 }
 0x3c2   :  { %v654_v44 = vmul.f32 1.442695, %v643_v24  ;;  %v2683_v4 = vmul.f32 %v1029_v17, %v2150_v19  ;;  %v648_v48 = vmul.f32 1.442695, %v640_v62 }
 0x3c4   :  { %v1074_v39 = vmin.f32 %v2683_v4, 0.0  ;;  %1965 = vpow2.f32 %v654_v44  ;;  %vm1066_vm2 = vcmp.gt.f32.partialorder %v2683_v4, 0.0 }
 0x3c5   :  { %v612_v51 = vpop.permute.xlu1 %611  ;;  %1967 = vpow2.f32 %v1086_v54 }
 0x3c6   :  { %v1084_v7 = vmul.f32 1.442695, %v1074_v39  ;;  %v2695_v19 = vmul.f32 %v2154_v20, %v612_v51  ;;  %v2707_v20 = vmul.f32 %v2163_v22, %v622_v60 }
 0x3c8   :  { %1969 = vpow2.f32 %v1084_v7  ;;  %v645_v55 = vmin.f32 %v2695_v19, 0.0  ;;  %v647_v35 = vmin.f32 %v2707_v20, 0.0  ;;  %vm637_vm8 = vcmp.gt.f32.partialorder %v2695_v19, 0.0 }
 0x3c9   :  { %v607_v42 = vpop.permute.xlu1 %606  ;;  %1971 = vpow2.f32 %v1088_v28 }
 0x3ca   :  { %v658_v50 = vmul.f32 1.442695, %v645_v55  ;;  %v2704_v29 = vmul.f32 %v607_v42, %v2156_v21  ;;  %1973 = vpow2.f32 %v1090_v27  ;;  %v662_v60 = vmul.f32 1.442695, %v647_v35 }
 0x3cc   :  { %v644_v8 = vmin.f32 %v2704_v29, 0.0  ;;  %v1054_v34 = vpop.permute.xlu0 %1053  ;;  %1975 = vpow2.f32 %v658_v50  ;;  %vm636_vm7 = vcmp.gt.f32.partialorder %v2704_v29, 0.0 }
 0x3cd   :  { %v2712_v1 = vmul.f32 %v2163_v22, %v1054_v34  ;;  %v1019_v56 = vpop.permute.xlu1 %1018  ;;  %1977 = vpow2.f32 %v648_v48 }
 0x3ce   :  { %v656_v21 = vmul.f32 1.442695, %v644_v8  ;;  %v2715_v3 = vmul.f32 %v1019_v56, %v2145_v15  ;;  %v1966_v43 = vpop.eup %1965 }
 0x3cf   :  { %v1079_v12 = vmin.f32 %v2712_v1, 0.0  ;;  %v1968_v22 = vpop.eup %1967  ;;  %v1757_v30 = vadd.f32 -1.0, %v1966_v43  ;;  %vm1071_vm1 = vcmp.gt.f32.partialorder %v2712_v1, 0.0 }
 0x3d0   :  { %1979 = vpow2.f32 %v656_v21  ;;  %v1072_v18 = vmin.f32 %v2715_v3, 0.0  ;;  %v1765_v63 = vadd.f32 -1.0, %v1968_v22  ;;  %vm1064_vm12 = vcmp.gt.f32.partialorder %v2715_v3, 0.0 }
 0x3d1   :  { %v592_v31 = vpop.permute.xlu1 %591  ;;  %1981 = vpow2.f32 %v1092_v36  ;;  %v1094_v0 = vmul.f32 1.442695, %v1079_v12  ;;  %v675_v39 = vsel %vm635_vm3, %v2672_v10, %v1757_v30  ;;  %v2068_v30 = vmov 1  }
 0x3d2   :  { %v1970_v52 = vpop.eup %1969  ;;  %v1080_v6 = vmul.f32 1.442695, %v1072_v18  ;;  %v2721_v15 = vmul.f32 %v2141_v14, %v592_v31  ;;  %1983 = vpow2.f32 %v660_v45  ;;  %1863 = vset.pattern.permute.xlu1 %v2068_v30 }
 0x3d3   :  { %v1764_v47 = vadd.f32 -1.0, %v1970_v52  ;;  %v1972_v17 = vpop.eup %1971 }
 0x3d4   :  { %1985 = vpow2.f32 %v1080_v6  ;;  %v641_v46 = vmin.f32 %v2721_v15, 0.0  ;;  %v1974_v9 = vpop.eup %1973  ;;  %v1766_v51 = vadd.f32 -1.0, %v1972_v17  ;;  %vm633_vm3 = vcmp.gt.f32.partialorder %v2721_v15, 0.0 }
 0x3d5   :  { %v1106_v58 = vsel %vm1066_vm2, %v2683_v4, %v1764_v47  ;;  %v1024_v24 = vpop.permute.xlu1 %1023  ;;  %1987 = vpow2.f32 %v1094_v0  ;;  %v1767_v37 = vadd.f32 -1.0, %v1974_v9  ;;  %vm639_vm2 = vcmp.gt.f32.partialorder %v2707_v20, 0.0 }
 0x3d6   :  { %v650_v44 = vmul.f32 1.442695, %v641_v46  ;;  %v2730_v54 = vmul.f32 %v2141_v14, %v1024_v24  ;;  %v1114_v33 = vsel %vm217_vm6, %v674_v61, %v1106_v58  ;;  %1989 = vpow2.f32 %v662_v60  ;;  %v1976_v40 = vpop.eup %1975 }
 0x3d7   :  { %1772 = vmatmul.mubr.msk.f32.vlgmr.msra.gmra.mrb[0].mxu1 %vm39_vm0, %v1114_v33  ;;  %v1978_v32 = vpop.eup %1977  ;;  %v1107_v14 = vsel %vm1067_vm4, %v2668_v38, %v1765_v63  ;;  %v1759_v55 = vadd.f32 -1.0, %v1976_v40  ;;  %v1108_v38 = vsel %vm1068_vm5, %v2676_v5, %v1766_v51 }
 0x3d8   :  { %1991 = vpow2.f32 %v650_v44  ;;  %v1073_v4 = vmin.f32 %v2730_v54, 0.0  ;;  %1230 = vmatprep.mubr.f32.mxu1 %v2061_v13  ;;  %v1115_v28 = vsel %vm217_vm6, %v675_v39, %v1107_v14  ;;  %v1754_v50 = vadd.f32 -1.0, %v1978_v32 }
 0x3d9   :  { %v677_v56 = vsel %vm637_vm8, %v2695_v19, %v1759_v55  ;;  %vm1065_vm4 = vcmp.gt.f32.partialorder %v2730_v54, 0.0 }
 0x3da   :  { %v1980_v7 = vpop.eup %1979  ;;  %v1082_v62 = vmul.f32 1.442695, %v1073_v4  ;;  %v672_v35 = vsel %vm632_vm11, %v2686_v16, %v1754_v50 }
 0x3db   :  { %v1758_v10 = vadd.f32 -1.0, %v1980_v7  ;;  %1773 = vmatmul.mubr.msk.f32.gmra.mrb[2].mxu1 %vm39_vm0, %v1115_v28  ;;  %v1982_v27 = vpop.eup %1981 }
 0x3dc   :  { %1993 = vpow2.f32 %v1082_v62  ;;  %1236 = vmatprep.mubr.f32.mxu1 %v2061_v13  ;;  %v1984_v42 = vpop.eup %1983  ;;  %v1768_v34 = vadd.f32 -1.0, %v1982_v27 }
 0x3dd   :  { %v676_v23 = vsel %vm636_vm7, %v2704_v29, %v1758_v10  ;;  %v1109_v29 = vsel %vm1069_vm9, %v2680_v25, %v1767_v37  ;;  %v1760_v21 = vadd.f32 -1.0, %v1984_v42 }
 0x3de   :  { %v1986_v48 = vpop.eup %1985  ;;  %v1116_v8 = vsel %vm217_vm6, %v676_v23, %v1108_v38  ;;  %v1117_v43 = vsel %vm217_vm6, %v677_v56, %v1109_v29  ;;  %v1110_v18 = vsel %vm1070_vm13, %v2692_v57, %v1768_v34 }
 0x3df   :  { %v1762_v49 = vadd.f32 -1.0, %v1986_v48  ;;  %1774 = vmatmul.mubr.msk.f32.gmra.mrb[4].mxu1 %vm39_vm0, %v1116_v8  ;;  %v1988_v36 = vpop.eup %1987  ;;  %v678_v16 = vsel %vm638_vm14, %v2698_v11, %v1760_v21 }
 0x3e0   :  { %1242 = vmatprep.mubr.f32.mxu1 %v2061_v13  ;;  %v1990_v5 = vpop.eup %1989  ;;  %v1769_v22 = vadd.f32 -1.0, %v1988_v36  ;;  %v1118_v57 = vsel %vm217_vm6, %v678_v16, %v1110_v18 }
 0x3e1   :  { %v1104_v19 = vsel %vm1064_vm12, %v2715_v3, %v1762_v49  ;;  %v1761_v25 = vadd.f32 -1.0, %v1990_v5 }
 0x3e2   :  { %v1992_v45 = vpop.eup %1991  ;;  %v1112_v12 = vsel %vm217_vm6, %v672_v35, %v1104_v19  ;;  %v1111_v31 = vsel %vm1071_vm1, %v2712_v1, %v1769_v22 }
 0x3e3   :  { %1770 = vmatmul.mubr.msk.f32.vlgmr.msra.gmra.mrb[8].mxu0 %vm39_vm0, %v1112_v12  ;;  %1775 = vmatmul.mubr.msk.f32.gmra.mrb[6].mxu1 %vm39_vm0, %v1117_v43  ;;  %v1755_v3 = vadd.f32 -1.0, %v1992_v45  ;;  %v679_v11 = vsel %vm639_vm2, %v2707_v20, %v1761_v25 }
 0x3e4   :  { %1248 = vmatprep.mubr.f32.mxu1 %v2061_v13  ;;  %1218 = vmatprep.mubr.f32.mxu0 %v2061_v13  ;;  %v1119_v1 = vsel %vm217_vm6, %v679_v11, %v1111_v31 }
 0x3e5   :  { %v673_v0 = vsel %vm633_vm3, %v2721_v15, %v1755_v3 }
 0x3e6   :  { %v1994_v41 = vpop.eup %1993 }
 0x3e7   :  { %v1763_v52 = vadd.f32 -1.0, %v1994_v41  ;;  %1776 = vmatmul.mubr.msk.f32.gmra.mrb[8].mxu1 %vm39_vm0, %v1118_v57 }
 0x3e8   :  { %1254 = vmatprep.mubr.f32.mxu1 %v2061_v13 }
 0x3e9   :  { %v1105_v6 = vsel %vm1065_vm4, %v2730_v54, %v1763_v52 }
 0x3ea   :  { %v1113_v60 = vsel %vm217_vm6, %v673_v0, %v1105_v6 }
 0x3eb   :  { %1771 = vmatmul.mubr.msk.f32.gmra.mrb[10].mxu0 %vm39_vm0, %v1113_v60  ;;  %1777 = vmatmul.mubr.msk.f32.gmra.mrb[10].mxu1 %vm39_vm0, %v1119_v1 }
 0x4aa   :  { %v2782_v47 = vpop.f32.mrb[0].mxu1 }
 0x4ab   :  { %v2784_v46 = vpop.f32.mrb[1].mxu1 }
 0x4ae   :  { %v2786_v13 = vpop.f32.mrb[2].mxu1 }
 0x4af   :  { %v2788_v20 = vpop.f32.mrb[3].mxu1 }
 0x4b2   :  { %v2790_v15 = vpop.f32.mrb[4].mxu1 }
 0x4b3   :  { %v2792_v63 = vpop.f32.mrb[5].mxu1 }
 0x4b6   :  { %v2794_v61 = vpop.f32.mrb[8].mxu0  ;;  %v2796_v58 = vpop.f32.mrb[6].mxu1 }
 0x4b7   :  { %v2798_v24 = vpop.f32.mrb[9].mxu0  ;;  %v2800_v17 = vpop.f32.mrb[7].mxu1 }
 0x4b8   :  { %1366 = vperm.xlu0 %1862, %v2798_v24   ;;  %1263 = vperm.xlu1 %1863, %v2798_v24  }
 0x4ba   :  { %v2804_v44 = vpop.f32.mrb[8].mxu1 }
 0x4bb   :  { %v2806_v54 = vpop.f32.mrb[9].mxu1 }
 0x4bc   :  { %1273 = vperm.xlu1 %1863, %v2784_v46   ;;  %1864 = vset.pattern.permute.xlu0 %v2068_v30 }
 0x4be   :  { %v2809_v33 = vpop.f32.mrb[10].mxu0  ;;  %v2811_v9 = vpop.f32.mrb[10].mxu1 }
 0x4bf   :  { %v2813_v39 = vpop.f32.mrb[11].mxu1  ;;  %v2815_v40 = vpop.f32.mrb[11].mxu0 }
 0x4c0   :  { %1278 = vperm.xlu1 %1863, %v2788_v20   ;;  %1268 = vperm.xlu0 %1864, %v2815_v40  }
 0x4c4   :  { %1288 = vperm.xlu1 %1863, %v2800_v17   ;;  %1283 = vperm.xlu0 %1864, %v2792_v63  }
 0x4c8   :  { %1298 = vperm.xlu1 %1863, %v2813_v39   ;;  %1293 = vperm.xlu0 %1864, %v2806_v54  }
 0x4cc   :  { %1865 = vset.pattern.permute.xlu1 %v2067_v2  ;;  %1866 = vset.pattern.permute.xlu0 %v2067_v2 }
 0x4cd   :  { %1370 = vperm.xlu1 %1865, %v2815_v40   ;;  %1378 = vperm.xlu0 %1866, %v2788_v20  }
 0x4d1   :  { %1374 = vperm.xlu1 %1865, %v2784_v46   ;;  %1386 = vperm.xlu0 %1866, %v2800_v17  }
 0x4d5   :  { %1382 = vperm.xlu1 %1865, %v2792_v63   ;;  %1394 = vperm.xlu0 %1866, %v2813_v39  }
 0x4d9   :  { %1390 = vperm.xlu1 %1865, %v2806_v54   ;;  %1509 = vrot.lane.b32.xlu0 %v2798_v24, %s2064_s0 }
 0x4dd   :  { %1511 = vrot.lane.b32.xlu1 %v2815_v40, %s2064_s0 }
 0x4e1   :  { %1513 = vrot.lane.b32.xlu1 %v2784_v46, %s2064_s0 }
 0x537   :  { %v1264_v2 = vpop.permute.xlu1 %1263  ;;  %v1367_v14 = vpop.permute.xlu0 %1366 }
 0x538   :  { %v1301_v4 = vmul.f32 %v2267_v59, %v1264_v2 }
 0x53a   :  { %v1309_v32 = vsel %vm217_vm6, %v1301_v4, 0.0 }
 0x53b   :  { %v1310_v51 = vrot.slane %v1309_v32, 4  ;;  %v1274_v7 = vpop.permute.xlu1 %1273 }
 0x53c   :  { %v1303_v62 = vmul.f32 %v2267_v59, %v1274_v7 }
 0x53d   :  { %v1311_v28 = vadd.f32 %v1310_v51, %v1309_v32 }
 0x53e   :  { %v1323_v55 = vsel %vm217_vm6, %v1303_v62, 0.0 }
 0x53f   :  { %v1312_v10 = vrot.slane %v1311_v28, 2  ;;  %v1324_v27 = vrot.slane %v1323_v55, 4  ;;  %v1269_v42 = vpop.permute.xlu0 %1268  ;;  %v1279_v37 = vpop.permute.xlu1 %1278 }
 0x540   :  { %v1302_v38 = vmul.f32 %v2267_v59, %v1269_v42  ;;  %v1304_v50 = vmul.f32 %v2267_v59, %v1279_v37 }
 0x541   :  { %v1313_v23 = vadd.f32 %v1312_v10, %v1311_v28  ;;  %v1325_v48 = vadd.f32 %v1324_v27, %v1323_v55 }
 0x542   :  { %v1316_v8 = vsel %vm217_vm6, %v1302_v38, 0.0  ;;  %v1330_v34 = vsel %vm217_vm6, %v1304_v50, 0.0 }
 0x543   :  { %v1314_v56 = vrot.slane %v1313_v23, 1  ;;  %v1326_v49 = vrot.slane %v1325_v48, 2  ;;  %v1317_v36 = vrot.slane %v1316_v8, 4  ;;  %v1331_v5 = vrot.slane %v1330_v34, 4  ;;  %v1284_v29 = vpop.permute.xlu0 %1283  ;;  %v1289_v21 = vpop.permute.xlu1 %1288 }
 0x544   :  { %v1305_v35 = vmul.f32 %v2267_v59, %v1284_v29  ;;  %v1306_v19 = vmul.f32 %v2267_v59, %v1289_v21 }
 0x545   :  { %v1315_v45 = vadd.f32 %v1314_v56, %v1313_v23  ;;  %v1318_v12 = vadd.f32 %v1317_v36, %v1316_v8  ;;  %v1332_v43 = vadd.f32 %v1331_v5, %v1330_v34  ;;  %v1327_v18 = vadd.f32 %v1326_v49, %v1325_v48 }
 0x546   :  { %v1337_v22 = vsel %vm217_vm6, %v1305_v35, 0.0  ;;  %v1344_v25 = vsel %vm217_vm6, %v1306_v19, 0.0 }
 0x547   :  { %v1319_v16 = vrot.slane %v1318_v12, 2  ;;  %v1333_v3 = vrot.slane %v1332_v43, 2  ;;  %v1338_v41 = vrot.slane %v1337_v22, 4  ;;  %v1345_v57 = vrot.slane %v1344_v25, 4  ;;  %v1294_v31 = vpop.permute.xlu0 %1293  ;;  %v1299_v52 = vpop.permute.xlu1 %1298 }
 0x548   :  { %v1307_v11 = vmul.f32 %v2267_v59, %v1294_v31  ;;  %v1308_v0 = vmul.f32 %v2267_v59, %v1299_v52  ;;  %v1397_v6 = vadd.f32 %v1367_v14, %v1315_v45  ;;  %v1328_v60 = vrot.slane %v1327_v18, 1 }
 0x549   :  { %v1339_v1 = vadd.f32 %v1338_v41, %v1337_v22  ;;  %v1346_v30 = vadd.f32 %v1345_v57, %v1344_v25  ;;  %v1334_v2 = vadd.f32 %v1333_v3, %v1332_v43  ;;  %v1320_v4 = vadd.f32 %v1319_v16, %v1318_v12 }
 0x54a   :  { %v1351_v32 = vsel %vm217_vm6, %v1307_v11, 0.0  ;;  %v1358_v51 = vsel %vm217_vm6, %v1308_v0, 0.0  ;;  %vm1405_vm0 = vcmp.ge.f32.partialorder %v1397_v6, 0.0  ;;  %v1413_v7 = vmul.f32 0.2, %v1397_v6 }
 0x54b   :  { %v1340_v62 = vrot.slane %v1339_v1, 2  ;;  %v1347_v28 = vrot.slane %v1346_v30, 2  ;;  %v1352_v55 = vrot.slane %v1351_v32, 4  ;;  %v1359_v10 = vrot.slane %v1358_v51, 4 }
 0x54c   :  { %v1379_v27 = vpop.permute.xlu0 %1378  ;;  %v1335_v42 = vrot.slane %v1334_v2, 1  ;;  %v1321_v37 = vrot.slane %v1320_v4, 1  ;;  %v1371_v59 = vpop.permute.xlu1 %1370  ;;  %v1421_v14 = vsel %vm1405_vm0, %v1397_v6, %v1413_v7  ;;  %v1329_v21 = vadd.f32 %v1328_v60, %v1327_v18 }
 0x54d   :  { %v1353_v38 = vadd.f32 %v1352_v55, %v1351_v32  ;;  %v1360_v50 = vadd.f32 %v1359_v10, %v1358_v51  ;;  %v2856_v23 = vsel %vm274_vm10, %v1421_v14, -9e+15  ;;  %v1348_v48 = vadd.f32 %v1347_v28, %v1346_v30 }
 0x54e   :  { %v1336_v8 = vadd.f32 %v1335_v42, %v1334_v2  ;;  %v1322_v34 = vadd.f32 %v1321_v37, %v1320_v4  ;;  %v1437_v56 = vsel %vm217_vm6, %v2856_v23, -inf  ;;  %v1341_v49 = vadd.f32 %v1340_v62, %v1339_v1 }
 0x54f   :  { %v1354_v36 = vrot.slane %v1353_v38, 2  ;;  %v1361_v5 = vrot.slane %v1360_v50, 2  ;;  %1438 = vmax.xlane.f32.xlu1 %v1437_v56  ;;  %v1349_v29 = vrot.slane %v1348_v48, 1 }
 0x550   :  { %v1400_v35 = vadd.f32 %v1379_v27, %v1336_v8  ;;  %v1398_v19 = vadd.f32 %v1371_v59, %v1322_v34  ;;  %v1387_v45 = vpop.permute.xlu0 %1386  ;;  %v1375_v12 = vpop.permute.xlu1 %1374  ;;  %v1342_v43 = vrot.slane %v1341_v49, 1 }
 0x551   :  { %v1350_v22 = vadd.f32 %v1349_v29, %v1348_v48  ;;  %v1399_v25 = vadd.f32 %v1375_v12, %v1329_v21  ;;  %v1362_v16 = vadd.f32 %v1361_v5, %v1360_v50  ;;  %v1355_v3 = vadd.f32 %v1354_v36, %v1353_v38 }
 0x552   :  { %vm1408_vm5 = vcmp.ge.f32.partialorder %v1400_v35, 0.0  ;;  %v1416_v41 = vmul.f32 0.2, %v1400_v35  ;;  %vm1406_vm7 = vcmp.ge.f32.partialorder %v1398_v19, 0.0  ;;  %v1414_v57 = vmul.f32 0.2, %v1398_v19 }
 0x553   :  { %v1402_v31 = vadd.f32 %v1387_v45, %v1350_v22  ;;  %vm1407_vm8 = vcmp.ge.f32.partialorder %v1399_v25, 0.0  ;;  %v1415_v52 = vmul.f32 0.2, %v1399_v25  ;;  %v1363_v11 = vrot.slane %v1362_v16, 1 }
 0x554   :  { %v1343_v0 = vadd.f32 %v1342_v43, %v1341_v49  ;;  %v1383_v6 = vpop.permute.xlu1 %1382  ;;  %v1424_v18 = vsel %vm1408_vm5, %v1400_v35, %v1416_v41  ;;  %v1422_v60 = vsel %vm1406_vm7, %v1398_v19, %v1414_v57  ;;  %v1356_v1 = vrot.slane %v1355_v3, 1  ;;  %v1395_v32 = vpop.permute.xlu0 %1394 }
 0x555   :  { %vm1410_vm9 = vcmp.ge.f32.partialorder %v1402_v31, 0.0  ;;  %v1418_v30 = vmul.f32 0.2, %v1402_v31  ;;  %v1364_v2 = vadd.f32 %v1363_v11, %v1362_v16  ;;  %v2862_v4 = vsel %vm274_vm10, %v1424_v18, -9e+15 }
 0x556   :  { %v1401_v51 = vadd.f32 %v1383_v6, %v1343_v0  ;;  %v1446_v7 = vsel %vm217_vm6, %v2862_v4, -inf  ;;  %v2868_v62 = vsel %vm274_vm10, %v1422_v60, -9e+15  ;;  %v1357_v28 = vadd.f32 %v1356_v1, %v1355_v3 }
 0x557   :  { %v1404_v55 = vadd.f32 %v1395_v32, %v1364_v2  ;;  %1447 = vmax.xlane.f32.xlu1 %v1446_v7  ;;  %v1440_v10 = vsel %vm217_vm6, %v2868_v62, -inf  ;;  %v1426_v27 = vsel %vm1410_vm9, %v1402_v31, %v1418_v30  ;;  %v1423_v42 = vsel %vm1407_vm8, %v1399_v25, %v1415_v52 }
 0x558   :  { %vm1409_vm11 = vcmp.ge.f32.partialorder %v1401_v51, 0.0  ;;  %v1417_v37 = vmul.f32 0.2, %v1401_v51  ;;  %1441 = vmax.xlane.f32.xlu0 %v1440_v10  ;;  %v1391_v59 = vpop.permute.xlu1 %1390  ;;  %v2875_v14 = vsel %vm274_vm10, %v1426_v27, -9e+15  ;;  %v1510_v22 = vpop.permute.xlu0 %1509 }
 0x559   :  { %vm1412_vm12 = vcmp.ge.f32.partialorder %v1404_v55, 0.0  ;;  %v1420_v38 = vmul.f32 0.2, %v1404_v55  ;;  %v1403_v50 = vadd.f32 %v1391_v59, %v1357_v28  ;;  %v1452_v48 = vsel %vm217_vm6, %v2875_v14, -inf }
 0x55a   :  { %v1431_v8 = vsel %vm274_vm10, %v1423_v42, -9e+15  ;;  %v1425_v34 = vsel %vm1409_vm11, %v1401_v51, %v1417_v37  ;;  %v1533_v25 = vadd.f32 %v1510_v22, %v2798_v24 }
 0x55b   :  { %vm1411_vm13 = vcmp.ge.f32.partialorder %v1403_v50, 0.0  ;;  %v1419_v56 = vmul.f32 0.2, %v1403_v50  ;;  %1453 = vmax.xlane.f32.xlu1 %v1452_v48  ;;  %v1443_v49 = vsel %vm217_vm6, %v1431_v8, -inf  ;;  %v1428_v5 = vsel %vm1412_vm12, %v1404_v55, %v1420_v38 }
 0x55c   :  { %v1512_v36 = vpop.permute.xlu1 %1511  ;;  %1444 = vmax.xlane.f32.xlu0 %v1443_v49  ;;  %v1436_v21 = vsel %vm274_vm10, %v1428_v5, -9e+15  ;;  %v1433_v35 = vsel %vm274_vm10, %v1425_v34, -9e+15  ;;  %v1549_v16 = vmul.f32 0.2, %v1533_v25 }
 0x55d   :  { %v1534_v29 = vadd.f32 %v1512_v36, %v2815_v40  ;;  %v1458_v19 = vsel %vm217_vm6, %v1436_v21, -inf  ;;  %v1427_v45 = vsel %vm1411_vm13, %v1403_v50, %v1419_v56  ;;  %v1449_v12 = vsel %vm217_vm6, %v1433_v35, -inf }
 0x55e   :  { %v2891_v43 = vsel %vm274_vm10, %v1427_v45, -9e+15  ;;  %vm1541_vm14 = vcmp.ge.f32.partialorder %v1533_v25, 0.0 }
 0x55f   :  { %1459 = vmax.xlane.f32.xlu1 %v1458_v19  ;;  %v1455_v40 = vsel %vm217_vm6, %v2891_v43, -inf  ;;  %v1557_v3 = vsel %vm1541_vm14, %v1533_v25, %v1549_v16  ;;  %v1550_v11 = vmul.f32 0.2, %v1534_v29  ;;  %vm1542_vm10 = vcmp.ge.f32.partialorder %v1534_v29, 0.0 }
 0x560   :  { %1450 = vmax.xlane.f32.xlu0 %v1449_v12  ;;  %v1514_v53 = vpop.permute.xlu1 %1513  ;;  %v2904_v41 = vsel %vm421_vm15, %v1557_v3, -9e+15 }
 0x561   :  { %v1535_v24 = vadd.f32 %v1514_v53, %v2784_v46  ;;  %v1558_v6 = vsel %vm1542_vm10, %v1534_v29, %v1550_v11 }
 0x562   :  { %v2919_v30 = vsel %vm421_vm15, %v1558_v6, -9e+15 }
 0x563   :  { %v1551_v18 = vmul.f32 0.2, %v1535_v24  ;;  %vm1543_vm1 = vcmp.ge.f32.partialorder %v1535_v24, 0.0 }
 0x564   :  { %1456 = vmax.xlane.f32.xlu0 %v1455_v40 }
 0x565   :  { %v1559_v32 = vsel %vm1543_vm1, %v1535_v24, %v1551_v18 }
 0x570   :  { %1517 = vrot.lane.b32.xlu1 %v2792_v63, %s2064_s0 }
 0x57a   :  { %1515 = vrot.lane.b32.xlu0 %v2788_v20, %s2064_s0 }
 0x57e   :  { %1519 = vrot.lane.b32.xlu0 %v2800_v17, %s2064_s0 }
 0x5dc   :  { %v2906_v57 = vpop.xlane.xlu1 %1438 }
 0x5dd   :  { %v1461_v31 = vsub.f32 %v2856_v23, %v2906_v57  ;;  %v1573_v52 = vsub.f32 %v2904_v41, %v2906_v57 }
 0x5df   :  { %v1469_v0 = vmul.f32 1.442695, %v1461_v31 }
 0x5e1   :  { %1995 = vpow2.f32 %v1469_v0 }
 0x5e4   :  { %v2913_v60 = vpop.xlane.xlu1 %1447 }
 0x5e5   :  { %v2915_v1 = vpop.xlane.xlu0 %1441  ;;  %v1464_v23 = vsub.f32 %v2862_v4, %v2913_v60  ;;  %v2935_v4 = vsel %vm421_vm15, %v1559_v32, -9e+15 }
 0x5e6   :  { %v1462_v2 = vsub.f32 %v2868_v62, %v2915_v1  ;;  %v1574_v46 = vsub.f32 %v2919_v30, %v2915_v1 }
 0x5e7   :  { %v1475_v7 = vmul.f32 1.442695, %v1464_v23 }
 0x5e8   :  { %v1471_v51 = vmul.f32 1.442695, %v1462_v2  ;;  %v2927_v28 = vpop.xlane.xlu1 %1453 }
 0x5e9   :  { %v1466_v55 = vsub.f32 %v2875_v14, %v2927_v28  ;;  %v2931_v10 = vpop.xlane.xlu0 %1444 }
 0x5ea   :  { %1997 = vpow2.f32 %v1471_v51  ;;  %v1463_v62 = vsub.f32 %v1431_v8, %v2931_v10  ;;  %v1575_v42 = vsub.f32 %v2935_v4, %v2931_v10 }
 0x5eb   :  { %v1996_v27 = vpop.eup %1995  ;;  %1999 = vpow2.f32 %v1475_v7  ;;  %v1479_v37 = vmul.f32 1.442695, %v1466_v55 }
 0x5ec   :  { %v2940_v59 = vpop.xlane.xlu1 %1459  ;;  %v1485_v38 = vsel %vm217_vm6, %v1996_v27, 0.0  ;;  %v1473_v14 = vmul.f32 1.442695, %v1463_v62  ;;  %v1585_v41 = vmul.f32 1.442695, %v1575_v42 }
 0x5ed   :  { %v1468_v50 = vsub.f32 %v1436_v21, %v2940_v59  ;;  %1486 = vadd.xlane.f32.xlu0 %v1485_v38  ;;  %v2944_v48 = vpop.xlane.xlu0 %1450 }
 0x5ee   :  { %2001 = vpow2.f32 %v1473_v14  ;;  %v1465_v34 = vsub.f32 %v1433_v35, %v2944_v48  ;;  %v1581_v14 = vmul.f32 1.442695, %v1573_v52 }
 0x5ef   :  { %2003 = vpow2.f32 %v1479_v37  ;;  %v1483_v8 = vmul.f32 1.442695, %v1468_v50 }
 0x5f0   :  { %v1518_v56 = vpop.permute.xlu1 %1517  ;;  %v1477_v49 = vmul.f32 1.442695, %v1465_v34 }
 0x5f1   :  { %v1537_v36 = vadd.f32 %v1518_v56, %v2792_v63  ;;  %v2948_v5 = vpop.xlane.xlu0 %1456 }
 0x5f2   :  { %2005 = vpow2.f32 %v1477_v49  ;;  %v1467_v29 = vsub.f32 %v2891_v43, %v2948_v5 }
 0x5f3   :  { %vm1545_vm2 = vcmp.ge.f32.partialorder %v1537_v36, 0.0  ;;  %v1553_v21 = vmul.f32 0.2, %v1537_v36  ;;  %2007 = vpow2.f32 %v1483_v8 }
 0x5f4   :  { %v1998_v19 = vpop.eup %1997  ;;  %v1481_v45 = vmul.f32 1.442695, %v1467_v29 }
 0x5f5   :  { %v1561_v12 = vsel %vm1545_vm2, %v1537_v36, %v1553_v21  ;;  %v1488_v35 = vsel %vm217_vm6, %v1998_v19, 0.0  ;;  %v2000_v40 = vpop.eup %1999  ;;  %v1516_v25 = vpop.permute.xlu0 %1515 }
 0x5f6   :  { %v1569_v22 = vsel %vm421_vm15, %v1561_v12, -9e+15  ;;  %1489 = vadd.xlane.f32.xlu1 %v1488_v35  ;;  %2009 = vpow2.f32 %v1481_v45  ;;  %v1536_v16 = vadd.f32 %v1516_v25, %v2788_v20  ;;  %v1494_v3 = vsel %vm217_vm6, %v2000_v40, 0.0 }
 0x5f7   :  { %v1577_v63 = vsub.f32 %v1569_v22, %v2944_v48  ;;  %v1583_v48 = vmul.f32 1.442695, %v1574_v46 }
 0x5f8   :  { %v2002_v43 = vpop.eup %2001  ;;  %vm1544_vm3 = vcmp.ge.f32.partialorder %v1536_v16, 0.0  ;;  %v1552_v53 = vmul.f32 0.2, %v1536_v16 }
 0x5f9   :  { %v2004_v31 = vpop.eup %2003  ;;  %v1520_v11 = vpop.permute.xlu0 %1519  ;;  %v1491_v24 = vsel %vm217_vm6, %v2002_v43, 0.0  ;;  %v1589_v52 = vmul.f32 1.442695, %v1577_v63 }
 0x5fa   :  { %1495 = vadd.xlane.f32.xlu1 %v1494_v3  ;;  %v1560_v0 = vsel %vm1544_vm3, %v1536_v16, %v1552_v53  ;;  %v1538_v6 = vadd.f32 %v1520_v11, %v2800_v17  ;;  %1492 = vadd.xlane.f32.xlu0 %v1491_v24  ;;  %v1500_v32 = vsel %vm217_vm6, %v2004_v31, 0.0 }
 0x5fb   :  { %v1568_v18 = vsel %vm421_vm15, %v1560_v0, -9e+15 }
 0x5fc   :  { %v2006_v23 = vpop.eup %2005  ;;  %v1576_v20 = vsub.f32 %v1568_v18, %v2913_v60  ;;  %vm1546_vm4 = vcmp.ge.f32.partialorder %v1538_v6, 0.0  ;;  %v1554_v2 = vmul.f32 0.2, %v1538_v6 }
 0x5fd   :  { %v2008_v51 = vpop.eup %2007  ;;  %v1497_v7 = vsel %vm217_vm6, %v2006_v23, 0.0 }
 0x5fe   :  { %1501 = vadd.xlane.f32.xlu1 %v1500_v32  ;;  %v1562_v55 = vsel %vm1546_vm4, %v1538_v6, %v1554_v2  ;;  %1498 = vadd.xlane.f32.xlu0 %v1497_v7  ;;  %v1506_v37 = vsel %vm217_vm6, %v2008_v51, 0.0  ;;  %v1587_v36 = vmul.f32 1.442695, %v1576_v20 }
 0x5ff   :  { %v1570_v17 = vsel %vm421_vm15, %v1562_v55, -9e+15 }
 0x600   :  { %v2010_v27 = vpop.eup %2009  ;;  %v1578_v62 = vsub.f32 %v1570_v17, %v2927_v28 }
 0x601   :  { %v1503_v60 = vsel %vm217_vm6, %v2010_v27, 0.0 }
 0x602   :  { %1507 = vadd.xlane.f32.xlu1 %v1506_v37  ;;  %1504 = vadd.xlane.f32.xlu0 %v1503_v60  ;;  %v1591_v1 = vmul.f32 1.442695, %v1578_v62 }
 0x613   :  { %1521 = vrot.lane.b32.xlu1 %v2806_v54, %s2064_s0 }
 0x618   :  { %1523 = vrot.lane.b32.xlu0 %v2813_v39, %s2064_s0 }
 0x67a   :  { %v1487_v38 = vpop.xlane.xlu0 %1486 }
 0x67b   :  { %2011 = vrcp.f32 %v1487_v38 }
 0x67c   :  { %2013 = vpow2.f32 %v1581_v14 }
 0x683   :  { %v1490_v28 = vpop.xlane.xlu1 %1489 }
 0x684   :  { %2015 = vrcp.f32 %v1490_v28 }
 0x685   :  { %v2012_v50 = vpop.eup %2011 }
 0x686   :  { %v1605_v34 = vmul.f32 %v2012_v50, %v1487_v38  ;;  %v2014_v21 = vpop.eup %2013 }
 0x687   :  { %v1496_v8 = vpop.xlane.xlu1 %1495  ;;  %v1493_v49 = vpop.xlane.xlu0 %1492 }
 0x688   :  { %v1613_v56 = vsub.f32 2.0, %v1605_v34  ;;  %2017 = vrcp.f32 %v1496_v8 }
 0x689   :  { %2019 = vrcp.f32 %v1493_v49 }
 0x68a   :  { %2021 = vpow2.f32 %v1583_v48  ;;  %v1621_v29 = vmul.f32 %v2012_v50, %v1613_v56 }
 0x68b   :  { %v1502_v57 = vpop.xlane.xlu1 %1501  ;;  %v1499_v45 = vpop.xlane.xlu0 %1498 }
 0x68c   :  { %v1629_v19 = vmul.f32 %v2014_v21, %v1621_v29  ;;  %2023 = vrcp.f32 %v1502_v57 }
 0x68d   :  { %2025 = vrcp.f32 %v1499_v45 }
 0x68e   :  { %v2016_v30 = vpop.eup %2015  ;;  %2027 = vpow2.f32 %v1587_v36  ;;  %1639 = vperm.xlu1 %1865, %v1629_v19  }
 0x68f   :  { %2029 = vpow2.f32 %v1585_v41  ;;  %v1606_v46 = vmul.f32 %v2016_v30, %v1490_v28  ;;  %v1508_v12 = vpop.xlane.xlu1 %1507  ;;  %v1505_v35 = vpop.xlane.xlu0 %1504 }
 0x690   :  { %2031 = vpow2.f32 %v1589_v52 }
 0x691   :  { %2033 = vpow2.f32 %v1591_v1  ;;  %v1614_v40 = vsub.f32 2.0, %v1606_v46 }
 0x692   :  { %v2018_v22 = vpop.eup %2017  ;;  %2035 = vrcp.f32 %v1505_v35 }
 0x693   :  { %v2020_v10 = vpop.eup %2019  ;;  %v1622_v4 = vmul.f32 %v2016_v30, %v1614_v40  ;;  %v1608_v42 = vmul.f32 %v2018_v22, %v1496_v8  ;;  %2037 = vrcp.f32 %v1508_v12  ;;  %v1522_v25 = vpop.permute.xlu1 %1521 }
 0x694   :  { %v2022_v63 = vpop.eup %2021  ;;  %v1607_v16 = vmul.f32 %v2020_v10, %v1493_v49  ;;  %v1524_v43 = vpop.permute.xlu0 %1523  ;;  %v1539_v53 = vadd.f32 %v1522_v25, %v2806_v54 }
 0x695   :  { %v1630_v3 = vmul.f32 %v2022_v63, %v1622_v4  ;;  %v1616_v31 = vsub.f32 2.0, %v1608_v42  ;;  %v1540_v11 = vadd.f32 %v1524_v43, %v2813_v39 }
 0x696   :  { %v2024_v24 = vpop.eup %2023  ;;  %v1615_v0 = vsub.f32 2.0, %v1607_v16  ;;  %vm1547_vm6 = vcmp.ge.f32.partialorder %v1539_v53, 0.0  ;;  %v1555_v6 = vmul.f32 0.2, %v1539_v53 }
 0x697   :  { %v2026_v18 = vpop.eup %2025  ;;  %v1624_v23 = vmul.f32 %v2018_v22, %v1616_v31  ;;  %v1610_v20 = vmul.f32 %v2024_v24, %v1502_v57  ;;  %vm1548_vm0 = vcmp.ge.f32.partialorder %v1540_v11, 0.0  ;;  %v1556_v2 = vmul.f32 0.2, %v1540_v11  ;;  %1644 = vperm.xlu0 %1866, %v1630_v3  }
 0x698   :  { %v2028_v32 = vpop.eup %2027  ;;  %v1623_v51 = vmul.f32 %v2020_v10, %v1615_v0  ;;  %v1609_v7 = vmul.f32 %v2026_v18, %v1499_v45  ;;  %v1563_v55 = vsel %vm1547_vm6, %v1539_v53, %v1555_v6 }
 0x699   :  { %v2030_v17 = vpop.eup %2029  ;;  %v1632_v54 = vmul.f32 %v2028_v32, %v1624_v23  ;;  %v1618_v27 = vsub.f32 2.0, %v1610_v20  ;;  %v1564_v62 = vsel %vm1548_vm0, %v1540_v11, %v1556_v2  ;;  %v1571_v39 = vsel %vm421_vm15, %v1563_v55, -9e+15 }
 0x69a   :  { %v2032_v37 = vpop.eup %2031  ;;  %v1631_v60 = vmul.f32 %v2030_v17, %v1623_v51  ;;  %v1617_v38 = vsub.f32 2.0, %v1609_v7  ;;  %v1572_v14 = vsel %vm421_vm15, %v1564_v62, -9e+15  ;;  %v1579_v28 = vsub.f32 %v1571_v39, %v2948_v5 }
 0x69b   :  { %v2034_v50 = vpop.eup %2033  ;;  %v1626_v48 = vmul.f32 %v2024_v24, %v1618_v27  ;;  %v1580_v34 = vsub.f32 %v1572_v14, %v2940_v59  ;;  %1654 = vperm.xlu0 %1866, %v1632_v54  }
 0x69c   :  { %v2036_v8 = vpop.eup %2035  ;;  %v1625_v56 = vmul.f32 %v2026_v18, %v1617_v38  ;;  %v1593_v49 = vmul.f32 1.442695, %v1579_v28  ;;  %1649 = vperm.xlu1 %1865, %v1631_v60  }
 0x69d   :  { %v2038_v36 = vpop.eup %2037  ;;  %v1634_v29 = vmul.f32 %v2034_v50, %v1626_v48  ;;  %v1595_v21 = vmul.f32 1.442695, %v1580_v34  ;;  %v1611_v57 = vmul.f32 %v2036_v8, %v1505_v35 }
 0x69e   :  { %v1633_v41 = vmul.f32 %v2032_v37, %v1625_v56  ;;  %2039 = vpow2.f32 %v1593_v49  ;;  %v1612_v26 = vmul.f32 %v2038_v36, %v1508_v12 }
 0x69f   :  { %2041 = vpow2.f32 %v1595_v21  ;;  %1664 = vperm.xlu0 %1866, %v1634_v29   ;;  %v1619_v5 = vsub.f32 2.0, %v1611_v57 }
 0x6a0   :  { %1659 = vperm.xlu1 %1865, %v1633_v41   ;;  %v1620_v52 = vsub.f32 2.0, %v1612_v26 }
 0x6a1   :  { %v1627_v19 = vmul.f32 %v2036_v8, %v1619_v5 }
 0x6a2   :  { %v1628_v59 = vmul.f32 %v2038_v36, %v1620_v52 }
 0x6a8   :  { %v2040_v45 = vpop.eup %2039 }
 0x6a9   :  { %v2042_v1 = vpop.eup %2041  ;;  %v1635_v30 = vmul.f32 %v2040_v45, %v1627_v19 }
 0x6aa   :  { %v1636_v46 = vmul.f32 %v2042_v1, %v1628_v59 }
 0x6ab   :  { %1669 = vperm.xlu1 %1865, %v1635_v30  }
 0x6ac   :  { %1674 = vperm.xlu0 %1866, %v1636_v46  }
 0x70d   :  { %v1640_v40 = vpop.permute.xlu1 %1639 }
 0x70e   :  { %v1677_v22 = vmul.f32 %v1640_v40, %v2794_v61 }
 0x710   :  { %v1693_v10 = vmin.f32 %v1677_v22, 0.0  ;;  %vm1685_vm15 = vcmp.gt.f32.partialorder %v1677_v22, 0.0 }
 0x712   :  { %v1701_v4 = vmul.f32 1.442695, %v1693_v10 }
 0x714   :  { %2043 = vpow2.f32 %v1701_v4 }
 0x716   :  { %v1645_v35 = vpop.permute.xlu0 %1644 }
 0x717   :  { %v1678_v12 = vmul.f32 %v1645_v35, %v2809_v33 }
 0x719   :  { %v1694_v42 = vmin.f32 %v1678_v12, 0.0  ;;  %vm1686_vm5 = vcmp.gt.f32.partialorder %v1678_v12, 0.0 }
 0x71a   :  { %v1655_v25 = vpop.permute.xlu0 %1654 }
 0x71b   :  { %v1703_v63 = vmul.f32 1.442695, %v1694_v42  ;;  %v1680_v16 = vmul.f32 %v1655_v25, %v2786_v13  ;;  %v1650_v43 = vpop.permute.xlu1 %1649 }
 0x71c   :  { %v1679_v53 = vmul.f32 %v1650_v43, %v2782_v47 }
 0x71d   :  { %2045 = vpow2.f32 %v1703_v63  ;;  %v1696_v3 = vmin.f32 %v1680_v16, 0.0  ;;  %vm1688_vm7 = vcmp.gt.f32.partialorder %v1680_v16, 0.0 }
 0x71e   :  { %v2044_v31 = vpop.eup %2043  ;;  %v1695_v11 = vmin.f32 %v1679_v53, 0.0  ;;  %v1665_v24 = vpop.permute.xlu0 %1664  ;;  %vm1687_vm8 = vcmp.gt.f32.partialorder %v1679_v53, 0.0 }
 0x71f   :  { %v1778_v61 = vadd.f32 -1.0, %v2044_v31  ;;  %v1707_v0 = vmul.f32 1.442695, %v1696_v3  ;;  %v1682_v6 = vmul.f32 %v1665_v24, %v2796_v58  ;;  %v1660_v18 = vpop.permute.xlu1 %1659 }
 0x720   :  { %v1705_v33 = vmul.f32 1.442695, %v1695_v11  ;;  %v1681_v23 = vmul.f32 %v1660_v18, %v2790_v15 }
 0x721   :  { %v1725_v20 = vsel %vm1685_vm15, %v1677_v22, %v1778_v61  ;;  %2047 = vpow2.f32 %v1707_v0  ;;  %v1698_v13 = vmin.f32 %v1682_v6, 0.0  ;;  %vm1690_vm9 = vcmp.gt.f32.partialorder %v1682_v6, 0.0 }
 0x722   :  { %1733 = vst [vmem:[%s3028_s5] sm:$0xff] %v1725_v20  ;;  %2049 = vpow2.f32 %v1705_v33  ;;  %v1697_v47 = vmin.f32 %v1681_v23, 0.0  ;;  %vm1689_vm11 = vcmp.gt.f32.partialorder %v1681_v23, 0.0 }
 0x723   :  { %v1711_v2 = vmul.f32 1.442695, %v1698_v13 }
 0x724   :  { %v1709_v32 = vmul.f32 1.442695, %v1697_v47 }
 0x725   :  { %2051 = vpow2.f32 %v1711_v2 }
 0x726   :  { %2053 = vpow2.f32 %v1709_v32 }
 0x727   :  { %v2046_v51 = vpop.eup %2045 }
 0x728   :  { %v1779_v58 = vadd.f32 -1.0, %v2046_v51 }
 0x72a   :  { %v1726_v7 = vsel %vm1686_vm5, %v1678_v12, %v1779_v58  ;;  %v1670_v55 = vpop.permute.xlu1 %1669 }
 0x72b   :  { %v2048_v17 = vpop.eup %2047  ;;  %1734 = vst [vmem:[%s3028_s5 + $0x8] sm:$0xff] %v1726_v7  ;;  %v1675_v15 = vpop.permute.xlu0 %1674  ;;  %v1683_v54 = vmul.f32 %v1670_v55, %v2804_v44 }
 0x72c   :  { %v2050_v27 = vpop.eup %2049  ;;  %v1781_v62 = vadd.f32 -1.0, %v2048_v17  ;;  %v1684_v39 = vmul.f32 %v1675_v15, %v2811_v9 }
 0x72d   :  { %v1780_v37 = vadd.f32 -1.0, %v2050_v27  ;;  %v1699_v60 = vmin.f32 %v1683_v54, 0.0  ;;  %vm1691_vm12 = vcmp.gt.f32.partialorder %v1683_v54, 0.0 }
 0x72e   :  { %v1728_v38 = vsel %vm1688_vm7, %v1680_v16, %v1781_v62  ;;  %v1700_v14 = vmin.f32 %v1684_v39, 0.0  ;;  %vm1692_vm13 = vcmp.gt.f32.partialorder %v1684_v39, 0.0 }
 0x72f   :  { %v2052_v28 = vpop.eup %2051  ;;  %1736 = vst [vmem:[%s3028_s5 + $0x18] sm:$0xff] %v1728_v38  ;;  %v1727_v50 = vsel %vm1687_vm8, %v1679_v53, %v1780_v37  ;;  %v1713_v48 = vmul.f32 1.442695, %v1699_v60 }
 0x730   :  { %v2054_v34 = vpop.eup %2053  ;;  %1735 = vst [vmem:[%s3028_s5 + $0x10] sm:$0xff] %v1727_v50  ;;  %v1783_v44 = vadd.f32 -1.0, %v2052_v28  ;;  %v1715_v9 = vmul.f32 1.442695, %v1700_v14 }
 0x731   :  { %v1782_v8 = vadd.f32 -1.0, %v2054_v34  ;;  %2055 = vpow2.f32 %v1713_v48 }
 0x732   :  { %v1730_v56 = vsel %vm1690_vm9, %v1682_v6, %v1783_v44  ;;  %2057 = vpow2.f32 %v1715_v9 }
 0x733   :  { %1738 = vst [vmem:[%s3028_s5 + $0x28] sm:$0xff] %v1730_v56  ;;  %v1729_v49 = vsel %vm1689_vm11, %v1681_v23, %v1782_v8 }
 0x734   :  { %1737 = vst [vmem:[%s3028_s5 + $0x20] sm:$0xff] %v1729_v49 }
 0x73b   :  { %v2056_v36 = vpop.eup %2055 }
 0x73c   :  { %v2058_v29 = vpop.eup %2057  ;;  %v1784_v21 = vadd.f32 -1.0, %v2056_v36 }
 0x73d   :  { %v1785_v41 = vadd.f32 -1.0, %v2058_v29 }
 0x73e   :  { %v1731_v57 = vsel %vm1691_vm12, %v1683_v54, %v1784_v21 }
 0x73f   :  { %v1732_v26 = vsel %vm1692_vm13, %v1684_v39, %v1785_v41  ;;  %1739 = vst [vmem:[%s3028_s5 + $0x30] sm:$0xff] %v1731_v57 }
 0x740   :  { %1740 = vst [vmem:[%s3028_s5 + $0x38] sm:$0xff] %v1732_v26 }

</bundles_post_ra>
